<compile_context>
chip_gen: v5e
topology: v5e:2x2
jax: 0.10.0
libtpu: 0.0.40
codegen_flags: <defaults>
</compile_context>

<pallas_src>
import functools

import jax
import jax.numpy as jnp
from jax.experimental import pallas as pl
from jax.experimental.pallas import tpu as pltpu


def mlp_head_kernel(
    src_ref, tgt_ref,
    w1_ref, b1_ref, w2_ref, b2_ref, w3_ref, b3_ref,
    wp_ref, bp_ref,
    rot_ref, trans_ref,
    src_acc, tgt_acc,
    *, n_points, tn,
):
    j = pl.program_id(1)

    # mask lanes beyond the true point count (tail tile / padded block)
    lane = jax.lax.broadcasted_iota(jnp.int32, (1, 1, tn), 2) + j * tn
    valid = lane < n_points
    neg = jnp.float32(-jnp.inf)
    src_t = jnp.where(valid, src_ref[...].astype(jnp.float32), neg)
    tgt_t = jnp.where(valid, tgt_ref[...].astype(jnp.float32), neg)

    @pl.when(j == 0)
    def _():
        src_acc[...] = jnp.full_like(src_acc, neg)
        tgt_acc[...] = jnp.full_like(tgt_acc, neg)

    # running elementwise max over N tiles (VPU)
    src_acc[...] = jnp.maximum(src_acc[...], src_t)
    tgt_acc[...] = jnp.maximum(tgt_acc[...], tgt_t)

    @pl.when(j == pl.num_programs(1) - 1)
    def _():
        # final lane reduction -> (1, E) each, concat == torch.cat(..., dim=1).max(-1)
        pooled = jnp.concatenate(
            [jnp.max(src_acc[...], axis=-1), jnp.max(tgt_acc[...], axis=-1)], axis=-1
        )                                                        # (1, 2E)

        def layer(h, w_ref, b_ref):
            y = jnp.dot(h, w_ref[...], preferred_element_type=jnp.float32) + b_ref[...]
            return jnp.maximum(y, 0.0)

        h = layer(pooled, w1_ref, b1_ref)                        # (1, E/2)
        h = layer(h, w2_ref, b2_ref)                             # (1, E/4)
        h = layer(h, w3_ref, b3_ref)                             # (1, E/8)

        # packed projection heads: cols 0:4 = proj_rot, cols 4:7 = proj_trans
        proj = jnp.dot(h, wp_ref[...], preferred_element_type=jnp.float32) + bp_ref[...]

        q = proj[:, 0:4]                                         # (1, 4)
        q = q / jnp.sqrt(jnp.sum(q * q, axis=-1, keepdims=True))
        trans = proj[:, 4:7]                                     # (1, 3)

        # quat2mat (DCP convention: quat = [x, y, z, w])
        x, y, z, w = q[:, 0:1], q[:, 1:2], q[:, 2:3], q[:, 3:4]
        w2, x2, y2, z2 = w * w, x * x, y * y, z * z
        wx, wy, wz = w * x, w * y, w * z
        xy, xz, yz = x * y, x * z, y * z
        rot_flat = jnp.concatenate(
            [
                w2 + x2 - y2 - z2, 2 * xy - 2 * wz, 2 * wy + 2 * xz,
                2 * wz + 2 * xy, w2 - x2 + y2 - z2, 2 * yz - 2 * wx,
                2 * xz - 2 * wy, 2 * wx + 2 * yz, w2 - x2 - y2 + z2,
            ],
            axis=-1,
        )                                                        # (1, 9)

        rot_ref[...] = rot_flat[None].astype(rot_ref.dtype)      # (1, 1, 9)
        trans_ref[...] = trans[None].astype(trans_ref.dtype)     # (1, 1, 3)


def mlp_head_forward(src, tgt, params, *, tn=512):
    """src, tgt: (B, emb_dims, N) float32 -> ((B,3,3) rotation, (B,3) translation)."""
    B, E, N = src.shape
    assert tgt.shape == (B, E, N)

    # lane-aligned N tile (multiple of 128, or the whole axis if N < 128)
    if N >= 128:
        tn_eff = min(tn, pl.cdiv(N, 128) * 128)
        tn_eff = max(128, (tn_eff // 128) * 128)
    else:
        tn_eff = N
    n_tiles = pl.cdiv(N, tn_eff)

    kernel = functools.partial(mlp_head_kernel, n_points=N, tn=tn_eff)

    def full_spec(a):
        return pl.BlockSpec(a.shape, lambda b, j: (0,) * a.ndim)

    weight_args = [
        params["w1"], params["b1"],
        params["w2"], params["b2"],
        params["w3"], params["b3"],
        params["w_proj"], params["b_proj"],
    ]
    weight_specs = [full_spec(a) for a in weight_args]

    rot_flat, trans = pl.pallas_call(
        kernel,
        out_shape=(
            jax.ShapeDtypeStruct((B, 1, 9), jnp.float32),
            jax.ShapeDtypeStruct((B, 1, 3), jnp.float32),
        ),
        grid_spec=pltpu.PrefetchScalarGridSpec(
            num_scalar_prefetch=0,
            grid=(B, n_tiles),
            in_specs=[
                pl.BlockSpec((1, E, tn_eff), lambda b, j: (b, 0, j)),
                pl.BlockSpec((1, E, tn_eff), lambda b, j: (b, 0, j)),
            ] + weight_specs,
            out_specs=(
                pl.BlockSpec((1, 1, 9), lambda b, j: (b, 0, 0)),
                pl.BlockSpec((1, 1, 3), lambda b, j: (b, 0, 0)),
            ),
            scratch_shapes=[
                pltpu.VMEM((1, E, tn_eff), jnp.float32),
                pltpu.VMEM((1, E, tn_eff), jnp.float32),
            ],
        ),
        compiler_params=pltpu.CompilerParams(
            dimension_semantics=("parallel", "arbitrary"),
            vmem_limit_bytes=32 * 1024 * 1024,
        ),
    )(src, tgt, *weight_args)

    return rot_flat.reshape(B, 3, 3), trans.reshape(B, 3)


def make_params(key, emb_dims=256, eps=1e-5):
    """Deterministic synthetic weights in torch conventions, with eval-mode BatchNorm
    folded into the Linear weights/biases, and the two projection heads packed into a
    single zero-padded lane-aligned (E/8, 128) matrix."""
    dims = [emb_dims * 2, emb_dims // 2, emb_dims // 4, emb_dims // 8]
    params = {}
    for l in range(1, 4):
        c_in, c_out = dims[l - 1], dims[l]
        key, kw, kb, kg, kbe, km, kv = jax.random.split(key, 7)
        w = jax.random.normal(kw, (c_out, c_in), jnp.float32) * (1.0 / jnp.sqrt(c_in))
        b = 0.1 * jax.random.normal(kb, (c_out,), jnp.float32)
        gamma = 1.0 + 0.1 * jax.random.normal(kg, (c_out,), jnp.float32)
        beta = 0.1 * jax.random.normal(kbe, (c_out,), jnp.float32)
        mean = 0.1 * jax.random.normal(km, (c_out,), jnp.float32)
        var = jax.random.uniform(kv, (c_out,), jnp.float32, 0.5, 1.5)
        s = gamma / jnp.sqrt(var + eps)
        params[f"w{l}"] = (w.T * s[None, :]).astype(jnp.float32)          # (c_in, c_out)
        params[f"b{l}"] = (b * s + beta - mean * s)[None, :]              # (1, c_out)

    c_in = dims[-1]
    key, kwr, kbr, kwt, kbt = jax.random.split(key, 5)
    wr = jax.random.normal(kwr, (4, c_in), jnp.float32) * (1.0 / jnp.sqrt(c_in))
    br = 0.1 * jax.random.normal(kbr, (4,), jnp.float32)
    wt = jax.random.normal(kwt, (3, c_in), jnp.float32) * (1.0 / jnp.sqrt(c_in))
    bt = 0.1 * jax.random.normal(kbt, (3,), jnp.float32)
    w_proj = jnp.zeros((c_in, 128), jnp.float32).at[:, 0:4].set(wr.T).at[:, 4:7].set(wt.T)
    b_proj = jnp.zeros((1, 128), jnp.float32).at[0, 0:4].set(br).at[0, 4:7].set(bt)
    params["w_proj"] = w_proj
    params["b_proj"] = b_proj
    return params


def quat2mat_ref(q):
    x, y, z, w = q[:, 0], q[:, 1], q[:, 2], q[:, 3]
    w2, x2, y2, z2 = w * w, x * x, y * y, z * z
    wx, wy, wz = w * x, w * y, w * z
    xy, xz, yz = x * y, x * z, y * z
    return jnp.stack(
        [
            w2 + x2 - y2 - z2, 2 * xy - 2 * wz, 2 * wy + 2 * xz,
            2 * wz + 2 * xy, w2 - x2 + y2 - z2, 2 * yz - 2 * wx,
            2 * xz - 2 * wy, 2 * wx + 2 * yz, w2 - x2 - y2 + z2,
        ],
        axis=1,
    ).reshape(-1, 3, 3)


def mlp_head_reference(src, tgt, params):
    """Pure-JAX reference (same math, no Pallas)."""
    pooled = jnp.concatenate([jnp.max(src, axis=-1), jnp.max(tgt, axis=-1)], axis=-1)
    h = pooled
    for l in (1, 2, 3):
        h = jnp.maximum(h @ params[f"w{l}"] + params[f"b{l}"], 0.0)
    proj = h @ params["w_proj"] + params["b_proj"]
    q = proj[:, 0:4]
    q = q / jnp.sqrt(jnp.sum(q * q, axis=-1, keepdims=True))
    t = proj[:, 4:7]
    return quat2mat_ref(q), t


if __name__ == "__main__":
    key = jax.random.PRNGKey(0)
    key, ks, kt = jax.random.split(key, 3)

    B, emb_dims, N = 2, 256, 300   # N deliberately not a multiple of the tile
    src = jax.random.normal(ks, (B, emb_dims, N), jnp.float32)
    tgt = jax.random.normal(kt, (B, emb_dims, N), jnp.float32)
    params = make_params(key, emb_dims=emb_dims)

    # small tile here to exercise multi-step accumulation + tail masking;
    # production default is tn=512.
    run = jax.jit(functools.partial(mlp_head_forward, tn=128))
    rot, trans = run(src, tgt, params)
    rot, trans = jax.block_until_ready((rot, trans))

    rot_ref, trans_ref = mlp_head_reference(src, tgt, params)
    assert rot.shape == (B, 3, 3), rot.shape
    assert trans.shape == (B, 3), trans.shape
    assert jnp.allclose(rot, rot_ref, atol=1e-4, rtol=1e-4), float(jnp.max(jnp.abs(rot - rot_ref)))
    assert jnp.allclose(trans, trans_ref, atol=1e-4, rtol=1e-4), float(jnp.max(jnp.abs(trans - trans_ref)))

    print("KERNEL_OK")
</pallas_src>

<mosaic_0001>
module attributes {stable_mosaic.version = 11 : i64} {
  func.func @mlp_head_kernel(%arg0: i32, %arg1: i32, %arg2: memref<1x256x128xf32, #tpu.memory_space<vmem>>, %arg3: memref<1x256x128xf32, #tpu.memory_space<vmem>>, %arg4: memref<512x128xf32, #tpu.memory_space<vmem>>, %arg5: memref<1x128xf32, #tpu.memory_space<vmem>>, %arg6: memref<128x64xf32, #tpu.memory_space<vmem>>, %arg7: memref<1x64xf32, #tpu.memory_space<vmem>>, %arg8: memref<64x32xf32, #tpu.memory_space<vmem>>, %arg9: memref<1x32xf32, #tpu.memory_space<vmem>>, %arg10: memref<32x128xf32, #tpu.memory_space<vmem>>, %arg11: memref<1x128xf32, #tpu.memory_space<vmem>>, %arg12: memref<1x1x9xf32, #tpu.memory_space<vmem>>, %arg13: memref<1x1x3xf32, #tpu.memory_space<vmem>>, %arg14: memref<1x256x128xf32, #tpu.memory_space<vmem>>, %arg15: memref<1x256x128xf32, #tpu.memory_space<vmem>>) attributes {dimension_semantics = [#tpu.dimension_semantics<parallel>, #tpu.dimension_semantics<arbitrary>], iteration_bounds = array<i64: 2, 3>, scalar_prefetch = 0 : i64, scratch_operands = 2 : i64, tpu.core_type = #tpu.core_type<tc>, window_params = [{transform_indices = @transform_0, window_bounds = array<i64: 1, 256, 128>}, {transform_indices = @transform_1, window_bounds = array<i64: 1, 256, 128>}, {pipeline_mode = #tpu.pipeline_mode<synchronous>, transform_indices = @transform_2, window_bounds = array<i64: 512, 128>}, {pipeline_mode = #tpu.pipeline_mode<synchronous>, transform_indices = @transform_3, window_bounds = array<i64: 1, 128>}, {pipeline_mode = #tpu.pipeline_mode<synchronous>, transform_indices = @transform_4, window_bounds = array<i64: 128, 64>}, {pipeline_mode = #tpu.pipeline_mode<synchronous>, transform_indices = @transform_5, window_bounds = array<i64: 1, 64>}, {pipeline_mode = #tpu.pipeline_mode<synchronous>, transform_indices = @transform_6, window_bounds = array<i64: 64, 32>}, {pipeline_mode = #tpu.pipeline_mode<synchronous>, transform_indices = @transform_7, window_bounds = array<i64: 1, 32>}, {pipeline_mode = #tpu.pipeline_mode<synchronous>, transform_indices = @transform_8, window_bounds = array<i64: 32, 128>}, {pipeline_mode = #tpu.pipeline_mode<synchronous>, transform_indices = @transform_9, window_bounds = array<i64: 1, 128>}, {transform_indices = @transform_10, window_bounds = array<i64: 1, 1, 9>}, {transform_indices = @transform_11, window_bounds = array<i64: 1, 1, 3>}]} {
    %0 = tpu.iota {dimensions = array<i32: 2>} : vector<1x1x128xi32>
    %c128_i32 = arith.constant 128 : i32
    %1 = arith.muli %arg1, %c128_i32 : i32
    %2 = vector.broadcast %1 : i32 to vector<1x1x128xi32>
    %3 = arith.addi %0, %2 : vector<1x1x128xi32>
    %c300_i32 = arith.constant 300 : i32
    %4 = vector.broadcast %c300_i32 : i32 to vector<1x1x128xi32>
    %5 = arith.cmpi slt, %3, %4 : vector<1x1x128xi32>
    %c0 = arith.constant 0 : index
    %c0_0 = arith.constant 0 : index
    %c0_1 = arith.constant 0 : index
    %6 = vector.load %arg2[%c0, %c0_0, %c0_1] : memref<1x256x128xf32, #tpu.memory_space<vmem>>, vector<1x256x128xf32>
    %cst = arith.constant 0xFF800000 : f32
    %7 = vector.shape_cast %5 : vector<1x1x128xi1> to vector<1x1x128xi1>
    %8 = vector.broadcast %7 : vector<1x1x128xi1> to vector<1x256x128xi1>
    %9 = vector.broadcast %cst : f32 to vector<1x256x128xf32>
    %10 = arith.select %8, %6, %9 : vector<1x256x128xi1>, vector<1x256x128xf32>
    %c0_2 = arith.constant 0 : index
    %c0_3 = arith.constant 0 : index
    %c0_4 = arith.constant 0 : index
    %11 = vector.load %arg3[%c0_2, %c0_3, %c0_4] : memref<1x256x128xf32, #tpu.memory_space<vmem>>, vector<1x256x128xf32>
    %cst_5 = arith.constant 0xFF800000 : f32
    %12 = vector.shape_cast %5 : vector<1x1x128xi1> to vector<1x1x128xi1>
    %13 = vector.broadcast %12 : vector<1x1x128xi1> to vector<1x256x128xi1>
    %14 = vector.broadcast %cst_5 : f32 to vector<1x256x128xf32>
    %15 = arith.select %13, %11, %14 : vector<1x256x128xi1>, vector<1x256x128xf32>
    %c0_i32 = arith.constant 0 : i32
    %16 = arith.cmpi eq, %arg1, %c0_i32 : i32
    %17 = arith.extui %16 : i1 to i32
    %cst_6 = arith.constant 0xFF800000 : f32
    %c0_i32_7 = arith.constant 0 : i32
    %18 = arith.cmpi ne, %17, %c0_i32_7 : i32
    scf.if %18 {
      %28 = vector.broadcast %cst_6 : f32 to vector<1x256x128xf32>
      %c0_21 = arith.constant 0 : index
      %c0_22 = arith.constant 0 : index
      %c0_23 = arith.constant 0 : index
      %29 = vector.load %arg14[%c0_21, %c0_22, %c0_23] : memref<1x256x128xf32, #tpu.memory_space<vmem>>, vector<1x256x128xf32>
      tpu.vector_store %arg14[%c0_21, %c0_22, %c0_23], %28 {strides = array<i32>} : memref<1x256x128xf32, #tpu.memory_space<vmem>>, vector<1x256x128xf32>,
      %30 = vector.broadcast %cst_6 : f32 to vector<1x256x128xf32>
      %c0_24 = arith.constant 0 : index
      %c0_25 = arith.constant 0 : index
      %c0_26 = arith.constant 0 : index
      %31 = vector.load %arg15[%c0_24, %c0_25, %c0_26] : memref<1x256x128xf32, #tpu.memory_space<vmem>>, vector<1x256x128xf32>
      tpu.vector_store %arg15[%c0_24, %c0_25, %c0_26], %30 {strides = array<i32>} : memref<1x256x128xf32, #tpu.memory_space<vmem>>, vector<1x256x128xf32>,
    } else {
    }
    %c0_8 = arith.constant 0 : index
    %c0_9 = arith.constant 0 : index
    %c0_10 = arith.constant 0 : index
    %19 = vector.load %arg14[%c0_8, %c0_9, %c0_10] : memref<1x256x128xf32, #tpu.memory_space<vmem>>, vector<1x256x128xf32>
    %20 = arith.maximumf %19, %10 : vector<1x256x128xf32>
    %c0_11 = arith.constant 0 : index
    %c0_12 = arith.constant 0 : index
    %c0_13 = arith.constant 0 : index
    %21 = vector.load %arg14[%c0_11, %c0_12, %c0_13] : memref<1x256x128xf32, #tpu.memory_space<vmem>>, vector<1x256x128xf32>
    tpu.vector_store %arg14[%c0_11, %c0_12, %c0_13], %20 {strides = array<i32>} : memref<1x256x128xf32, #tpu.memory_space<vmem>>, vector<1x256x128xf32>,
    %c0_14 = arith.constant 0 : index
    %c0_15 = arith.constant 0 : index
    %c0_16 = arith.constant 0 : index
    %22 = vector.load %arg15[%c0_14, %c0_15, %c0_16] : memref<1x256x128xf32, #tpu.memory_space<vmem>>, vector<1x256x128xf32>
    %23 = arith.maximumf %22, %15 : vector<1x256x128xf32>
    %c0_17 = arith.constant 0 : index
    %c0_18 = arith.constant 0 : index
    %c0_19 = arith.constant 0 : index
    %24 = vector.load %arg15[%c0_17, %c0_18, %c0_19] : memref<1x256x128xf32, #tpu.memory_space<vmem>>, vector<1x256x128xf32>
    tpu.vector_store %arg15[%c0_17, %c0_18, %c0_19], %23 {strides = array<i32>} : memref<1x256x128xf32, #tpu.memory_space<vmem>>, vector<1x256x128xf32>,
    %c2_i32 = arith.constant 2 : i32
    %25 = arith.cmpi eq, %arg1, %c2_i32 : i32
    %26 = arith.extui %25 : i1 to i32
    %c0_i32_20 = arith.constant 0 : i32
    %27 = arith.cmpi ne, %26, %c0_i32_20 : i32
    scf.if %27 {
      %c0_21 = arith.constant 0 : index
      %c0_22 = arith.constant 0 : index
      %c0_23 = arith.constant 0 : index
      %28 = vector.load %arg14[%c0_21, %c0_22, %c0_23] : memref<1x256x128xf32, #tpu.memory_space<vmem>>, vector<1x256x128xf32>
      %cst_24 = arith.constant dense<0xFF800000> : vector<1x256xf32>
      %29 = vector.multi_reduction <maximumf>, %28, %cst_24 [2] : vector<1x256x128xf32> to vector<1x256xf32>
      %c0_25 = arith.constant 0 : index
      %c0_26 = arith.constant 0 : index
      %c0_27 = arith.constant 0 : index
      %30 = vector.load %arg15[%c0_25, %c0_26, %c0_27] : memref<1x256x128xf32, #tpu.memory_space<vmem>>, vector<1x256x128xf32>
      %cst_28 = arith.constant dense<0xFF800000> : vector<1x256xf32>
      %31 = vector.multi_reduction <maximumf>, %30, %cst_28 [2] : vector<1x256x128xf32> to vector<1x256xf32>
      %32 = tpu.concatenate %29, %31 in 1 : vector<1x256xf32>, vector<1x256xf32> -> vector<1x512xf32>
      %c0_29 = arith.constant 0 : index
      %c0_30 = arith.constant 0 : index
      %33 = vector.load %arg4[%c0_29, %c0_30] : memref<512x128xf32, #tpu.memory_space<vmem>>, vector<512x128xf32>
      %cst_31 = arith.constant dense<0.000000e+00> : vector<1x128xf32>
      %34 = tpu.matmul %32, %33, %cst_31 {dimension_numbers = #tpu.dot_dimension_numbers<[1], [0], [0], [1], [0, 0, 1, 1], [], []>} : vector<1x512xf32>, vector<512x128xf32>, vector<1x128xf32> -> vector<1x128xf32>
      %c0_32 = arith.constant 0 : index
      %c0_33 = arith.constant 0 : index
      %35 = vector.load %arg5[%c0_32, %c0_33] : memref<1x128xf32, #tpu.memory_space<vmem>>, vector<1x128xf32>
      %36 = arith.addf %34, %35 : vector<1x128xf32>
      %cst_34 = arith.constant 0.000000e+00 : f32
      %37 = vector.broadcast %cst_34 : f32 to vector<1x128xf32>
      %38 = arith.maximumf %36, %37 : vector<1x128xf32>
      %c0_35 = arith.constant 0 : index
      %c0_36 = arith.constant 0 : index
      %39 = vector.load %arg6[%c0_35, %c0_36] : memref<128x64xf32, #tpu.memory_space<vmem>>, vector<128x64xf32>
      %cst_37 = arith.constant dense<0.000000e+00> : vector<1x64xf32>
      %40 = tpu.matmul %38, %39, %cst_37 {dimension_numbers = #tpu.dot_dimension_numbers<[1], [0], [0], [1], [0, 0, 1, 1], [], []>} : vector<1x128xf32>, vector<128x64xf32>, vector<1x64xf32> -> vector<1x64xf32>
      %c0_38 = arith.constant 0 : index
      %c0_39 = arith.constant 0 : index
      %41 = vector.load %arg7[%c0_38, %c0_39] : memref<1x64xf32, #tpu.memory_space<vmem>>, vector<1x64xf32>
      %42 = arith.addf %40, %41 : vector<1x64xf32>
      %cst_40 = arith.constant 0.000000e+00 : f32
      %43 = vector.broadcast %cst_40 : f32 to vector<1x64xf32>
      %44 = arith.maximumf %42, %43 : vector<1x64xf32>
      %c0_41 = arith.constant 0 : index
      %c0_42 = arith.constant 0 : index
      %45 = vector.load %arg8[%c0_41, %c0_42] : memref<64x32xf32, #tpu.memory_space<vmem>>, vector<64x32xf32>
      %cst_43 = arith.constant dense<0.000000e+00> : vector<1x32xf32>
      %46 = tpu.matmul %44, %45, %cst_43 {dimension_numbers = #tpu.dot_dimension_numbers<[1], [0], [0], [1], [0, 0, 1, 1], [], []>} : vector<1x64xf32>, vector<64x32xf32>, vector<1x32xf32> -> vector<1x32xf32>
      %c0_44 = arith.constant 0 : index
      %c0_45 = arith.constant 0 : index
      %47 = vector.load %arg9[%c0_44, %c0_45] : memref<1x32xf32, #tpu.memory_space<vmem>>, vector<1x32xf32>
      %48 = arith.addf %46, %47 : vector<1x32xf32>
      %cst_46 = arith.constant 0.000000e+00 : f32
      %49 = vector.broadcast %cst_46 : f32 to vector<1x32xf32>
      %50 = arith.maximumf %48, %49 : vector<1x32xf32>
      %c0_47 = arith.constant 0 : index
      %c0_48 = arith.constant 0 : index
      %51 = vector.load %arg10[%c0_47, %c0_48] : memref<32x128xf32, #tpu.memory_space<vmem>>, vector<32x128xf32>
      %cst_49 = arith.constant dense<0.000000e+00> : vector<1x128xf32>
      %52 = tpu.matmul %50, %51, %cst_49 {dimension_numbers = #tpu.dot_dimension_numbers<[1], [0], [0], [1], [0, 0, 1, 1], [], []>} : vector<1x32xf32>, vector<32x128xf32>, vector<1x128xf32> -> vector<1x128xf32>
      %c0_50 = arith.constant 0 : index
      %c0_51 = arith.constant 0 : index
      %53 = vector.load %arg11[%c0_50, %c0_51] : memref<1x128xf32, #tpu.memory_space<vmem>>, vector<1x128xf32>
      %54 = arith.addf %52, %53 : vector<1x128xf32>
      %55 = vector.extract_strided_slice %54 {offsets = [0, 0], sizes = [1, 4], strides = [1, 1]} : vector<1x128xf32> to vector<1x4xf32>
      %56 = arith.mulf %55, %55 : vector<1x4xf32>
      %cst_52 = arith.constant dense<0.000000e+00> : vector<1xf32>
      %57 = vector.multi_reduction <add>, %56, %cst_52 [1] : vector<1x4xf32> to vector<1xf32>
      %58 = vector.shape_cast %57 : vector<1xf32> to vector<1x1xf32>
      %59 = math.sqrt %58 : vector<1x1xf32>
      %60 = vector.broadcast %59 : vector<1x1xf32> to vector<1x4xf32>
      %61 = arith.divf %55, %60 : vector<1x4xf32>
      %62 = vector.extract_strided_slice %54 {offsets = [0, 4], sizes = [1, 3], strides = [1, 1]} : vector<1x128xf32> to vector<1x3xf32>
      %63 = vector.extract_strided_slice %61 {offsets = [0, 0], sizes = [1, 1], strides = [1, 1]} : vector<1x4xf32> to vector<1x1xf32>
      %64 = vector.extract_strided_slice %61 {offsets = [0, 1], sizes = [1, 1], strides = [1, 1]} : vector<1x4xf32> to vector<1x1xf32>
      %65 = vector.extract_strided_slice %61 {offsets = [0, 2], sizes = [1, 1], strides = [1, 1]} : vector<1x4xf32> to vector<1x1xf32>
      %66 = vector.extract_strided_slice %61 {offsets = [0, 3], sizes = [1, 1], strides = [1, 1]} : vector<1x4xf32> to vector<1x1xf32>
      %67 = arith.mulf %66, %66 : vector<1x1xf32>
      %68 = arith.mulf %63, %63 : vector<1x1xf32>
      %69 = arith.mulf %64, %64 : vector<1x1xf32>
      %70 = arith.mulf %65, %65 : vector<1x1xf32>
      %71 = arith.mulf %66, %63 : vector<1x1xf32>
      %72 = arith.mulf %66, %64 : vector<1x1xf32>
      %73 = arith.mulf %66, %65 : vector<1x1xf32>
      %74 = arith.mulf %63, %64 : vector<1x1xf32>
      %75 = arith.mulf %63, %65 : vector<1x1xf32>
      %76 = arith.mulf %64, %65 : vector<1x1xf32>
      %77 = arith.addf %67, %68 : vector<1x1xf32>
      %78 = arith.subf %77, %69 : vector<1x1xf32>
      %79 = arith.subf %78, %70 : vector<1x1xf32>
      %cst_53 = arith.constant 2.000000e+00 : f32
      %80 = vector.broadcast %cst_53 : f32 to vector<1x1xf32>
      %81 = arith.mulf %80, %74 : vector<1x1xf32>
      %cst_54 = arith.constant 2.000000e+00 : f32
      %82 = vector.broadcast %cst_54 : f32 to vector<1x1xf32>
      %83 = arith.mulf %82, %73 : vector<1x1xf32>
      %84 = arith.subf %81, %83 : vector<1x1xf32>
      %cst_55 = arith.constant 2.000000e+00 : f32
      %85 = vector.broadcast %cst_55 : f32 to vector<1x1xf32>
      %86 = arith.mulf %85, %72 : vector<1x1xf32>
      %cst_56 = arith.constant 2.000000e+00 : f32
      %87 = vector.broadcast %cst_56 : f32 to vector<1x1xf32>
      %88 = arith.mulf %87, %75 : vector<1x1xf32>
      %89 = arith.addf %86, %88 : vector<1x1xf32>
      %cst_57 = arith.constant 2.000000e+00 : f32
      %90 = vector.broadcast %cst_57 : f32 to vector<1x1xf32>
      %91 = arith.mulf %90, %73 : vector<1x1xf32>
      %cst_58 = arith.constant 2.000000e+00 : f32
      %92 = vector.broadcast %cst_58 : f32 to vector<1x1xf32>
      %93 = arith.mulf %92, %74 : vector<1x1xf32>
      %94 = arith.addf %91, %93 : vector<1x1xf32>
      %95 = arith.subf %67, %68 : vector<1x1xf32>
      %96 = arith.addf %95, %69 : vector<1x1xf32>
      %97 = arith.subf %96, %70 : vector<1x1xf32>
      %cst_59 = arith.constant 2.000000e+00 : f32
      %98 = vector.broadcast %cst_59 : f32 to vector<1x1xf32>
      %99 = arith.mulf %98, %76 : vector<1x1xf32>
      %cst_60 = arith.constant 2.000000e+00 : f32
      %100 = vector.broadcast %cst_60 : f32 to vector<1x1xf32>
      %101 = arith.mulf %100, %71 : vector<1x1xf32>
      %102 = arith.subf %99, %101 : vector<1x1xf32>
      %cst_61 = arith.constant 2.000000e+00 : f32
      %103 = vector.broadcast %cst_61 : f32 to vector<1x1xf32>
      %104 = arith.mulf %103, %75 : vector<1x1xf32>
      %cst_62 = arith.constant 2.000000e+00 : f32
      %105 = vector.broadcast %cst_62 : f32 to vector<1x1xf32>
      %106 = arith.mulf %105, %72 : vector<1x1xf32>
      %107 = arith.subf %104, %106 : vector<1x1xf32>
      %cst_63 = arith.constant 2.000000e+00 : f32
      %108 = vector.broadcast %cst_63 : f32 to vector<1x1xf32>
      %109 = arith.mulf %108, %71 : vector<1x1xf32>
      %cst_64 = arith.constant 2.000000e+00 : f32
      %110 = vector.broadcast %cst_64 : f32 to vector<1x1xf32>
      %111 = arith.mulf %110, %76 : vector<1x1xf32>
      %112 = arith.addf %109, %111 : vector<1x1xf32>
      %113 = arith.subf %67, %68 : vector<1x1xf32>
      %114 = arith.subf %113, %69 : vector<1x1xf32>
      %115 = arith.addf %114, %70 : vector<1x1xf32>
      %116 = tpu.concatenate %79, %84, %89, %94, %97, %102, %107, %112, %115 in 1 : vector<1x1xf32>, vector<1x1xf32>, vector<1x1xf32>, vector<1x1xf32>, vector<1x1xf32>, vector<1x1xf32>, vector<1x1xf32>, vector<1x1xf32>, vector<1x1xf32> -> vector<1x9xf32>
      %117 = vector.shape_cast %116 : vector<1x9xf32> to vector<1x1x9xf32>
      %c0_65 = arith.constant 0 : index
      %c0_66 = arith.constant 0 : index
      %c0_67 = arith.constant 0 : index
      %118 = vector.load %arg12[%c0_65, %c0_66, %c0_67] : memref<1x1x9xf32, #tpu.memory_space<vmem>>, vector<1x1x9xf32>
      tpu.vector_store %arg12[%c0_65, %c0_66, %c0_67], %117 {strides = array<i32>} : memref<1x1x9xf32, #tpu.memory_space<vmem>>, vector<1x1x9xf32>,
      %119 = vector.shape_cast %62 : vector<1x3xf32> to vector<1x1x3xf32>
      %c0_68 = arith.constant 0 : index
      %c0_69 = arith.constant 0 : index
      %c0_70 = arith.constant 0 : index
      %120 = vector.load %arg13[%c0_68, %c0_69, %c0_70] : memref<1x1x3xf32, #tpu.memory_space<vmem>>, vector<1x1x3xf32>
      tpu.vector_store %arg13[%c0_68, %c0_69, %c0_70], %119 {strides = array<i32>} : memref<1x1x3xf32, #tpu.memory_space<vmem>>, vector<1x1x3xf32>,
    } else {
    }
    return
  }
  func.func @transform_0(%arg0: i32, %arg1: i32) -> (i32, i32, i32) {
    %c0_i32 = arith.constant 0 : i32
    %c0_i32_0 = arith.constant 0 : i32
    return %arg0, %c0_i32, %arg1 : i32, i32, i32
  }
  func.func @transform_1(%arg0: i32, %arg1: i32) -> (i32, i32, i32) {
    %c0_i32 = arith.constant 0 : i32
    %c0_i32_0 = arith.constant 0 : i32
    return %arg0, %c0_i32, %arg1 : i32, i32, i32
  }
  func.func @transform_2(%arg0: i32, %arg1: i32) -> (i32, i32) {
    %c0_i32 = arith.constant 0 : i32
    %c0_i32_0 = arith.constant 0 : i32
    %c0_i32_1 = arith.constant 0 : i32
    return %c0_i32, %c0_i32_0 : i32, i32
  }
  func.func @transform_3(%arg0: i32, %arg1: i32) -> (i32, i32) {
    %c0_i32 = arith.constant 0 : i32
    %c0_i32_0 = arith.constant 0 : i32
    %c0_i32_1 = arith.constant 0 : i32
    return %c0_i32, %c0_i32_0 : i32, i32
  }
  func.func @transform_4(%arg0: i32, %arg1: i32) -> (i32, i32) {
    %c0_i32 = arith.constant 0 : i32
    %c0_i32_0 = arith.constant 0 : i32
    %c0_i32_1 = arith.constant 0 : i32
    return %c0_i32, %c0_i32_0 : i32, i32
  }
  func.func @transform_5(%arg0: i32, %arg1: i32) -> (i32, i32) {
    %c0_i32 = arith.constant 0 : i32
    %c0_i32_0 = arith.constant 0 : i32
    %c0_i32_1 = arith.constant 0 : i32
    return %c0_i32, %c0_i32_0 : i32, i32
  }
  func.func @transform_6(%arg0: i32, %arg1: i32) -> (i32, i32) {
    %c0_i32 = arith.constant 0 : i32
    %c0_i32_0 = arith.constant 0 : i32
    %c0_i32_1 = arith.constant 0 : i32
    return %c0_i32, %c0_i32_0 : i32, i32
  }
  func.func @transform_7(%arg0: i32, %arg1: i32) -> (i32, i32) {
    %c0_i32 = arith.constant 0 : i32
    %c0_i32_0 = arith.constant 0 : i32
    %c0_i32_1 = arith.constant 0 : i32
    return %c0_i32, %c0_i32_0 : i32, i32
  }
  func.func @transform_8(%arg0: i32, %arg1: i32) -> (i32, i32) {
    %c0_i32 = arith.constant 0 : i32
    %c0_i32_0 = arith.constant 0 : i32
    %c0_i32_1 = arith.constant 0 : i32
    return %c0_i32, %c0_i32_0 : i32, i32
  }
  func.func @transform_9(%arg0: i32, %arg1: i32) -> (i32, i32) {
    %c0_i32 = arith.constant 0 : i32
    %c0_i32_0 = arith.constant 0 : i32
    %c0_i32_1 = arith.constant 0 : i32
    return %c0_i32, %c0_i32_0 : i32, i32
  }
  func.func @transform_10(%arg0: i32, %arg1: i32) -> (i32, i32, i32) {
    %c0_i32 = arith.constant 0 : i32
    %c0_i32_0 = arith.constant 0 : i32
    %c0_i32_1 = arith.constant 0 : i32
    return %arg0, %c0_i32, %c0_i32_0 : i32, i32, i32
  }
  func.func @transform_11(%arg0: i32, %arg1: i32) -> (i32, i32, i32) {
    %c0_i32 = arith.constant 0 : i32
    %c0_i32_0 = arith.constant 0 : i32
    %c0_i32_1 = arith.constant 0 : i32
    return %arg0, %c0_i32, %c0_i32_0 : i32, i32, i32
  }
}

</mosaic_0001>

<bundles_post_ra>
// kernel: mlp_head_forward.1
= control target key start
LH: loop header
LB: loop body
LE: loop exit
PB: predicated region body
PF: predicated region fallthrough
CT: control target
= control target key end

     0   :  { %s3728_s0 = inlined_call_operand.vmem [shape: f32[2,256,300], index: 0, kind: input, shape index: {}]   ;;  %s3729_s1 = inlined_call_operand.vmem [shape: f32[2,256,300], index: 1, kind: input, shape index: {}]   ;;  %s3730_s2 = inlined_call_operand.vmem [shape: f32[512,128], index: 2, kind: input, shape index: {}]   ;;  %s3731_s3 = inlined_call_operand.vmem [shape: f32[1,128], index: 3, kind: input, shape index: {}]   ;;  %s3732_s4 = inlined_call_operand.vmem [shape: f32[128,64], index: 4, kind: input, shape index: {}]   ;;  %s3733_s5 = inlined_call_operand.vmem [shape: f32[1,64], index: 5, kind: input, shape index: {}]   ;;  %s3734_s6 = inlined_call_operand.vmem [shape: f32[64,32], index: 6, kind: input, shape index: {}]   ;;  %s3735_s7 = inlined_call_operand.vmem [shape: f32[1,32], index: 7, kind: input, shape index: {}]   ;;  %s3736_s8 = inlined_call_operand.vmem [shape: f32[32,128], index: 8, kind: input, shape index: {}]   ;;  %s3737_s9 = inlined_call_operand.vmem [shape: f32[1,128], index: 9, kind: input, shape index: {}]   ;;  %s3738_s10 = inlined_call_operand.vmem [shape: f32[2,1,9], index: 10, kind: output, shape index: {0}]   ;;  %s3739_s11 = inlined_call_operand.hbm [shape: f32[2,1,3], index: 11, kind: output, shape index: {1}]  }
   0x1   :  { %3748 = sst [smem:[#allocation29_spill]] %s3728_s0 }
   0x2   :  { %3749 = sst [smem:[#allocation30_spill]] %s3729_s1 }
   0x3   :  { %3750 = sst [smem:[#allocation31_spill]] %s3730_s2 }
   0x4   :  { %3751 = sst [smem:[#allocation32_spill]] %s3735_s7 }
   0x5   :  { %3752 = sst [smem:[#allocation33_spill]] %s3737_s9 }
   0x6   :  { %3753 = sst [smem:[#allocation34_spill]] %s3739_s11 }
   0x7   :  { %17 = vsyncpa [#allocation7], 0 }
   0x8   :  { %19 = vsyncpa [#allocation7 + $0x1], 0  ;;  %s2411_s17 = smov 0   ;;  %s2413_s18 = smov 0  }
   0x9   :  { %s2415_s19 = smov 0   ;;  %s2417_s20 = smov 0  }
   0xa   :  { %s2419_s21 = smov 0   ;;  %s2421_s22 = smov 0  }
   0xb   :  { %s2423_s23 = smov 0   ;;  %s2425_s24 = smov 0  }
   0xc   :  { %s2427_s25 = smov 0   ;;  %s2429_s26 = smov 0  }
   0xd LB: > { %3754 = sst [smem:[#allocation9_spill]] %s2302_s17  ;;  %s2106_s27 = sadd.s32 4294967295, %s2338_s26   ;;  %s2338_s26 = sphi %s2429_s26, %s25_s26   ;;  %s2334_s25 = sphi %s2427_s25, %s3813_s25   ;;  %s2330_s24 = sphi %s2425_s24, %s3812_s24   ;;  %s2326_s23 = sphi %s2423_s23, %s3811_s23   ;;  %s2322_s22 = sphi %s2421_s22, %s3810_s22   ;;  %s2318_s21 = sphi %s2419_s21, %s3809_s21   ;;  %s2314_s20 = sphi %s2417_s20, %s3808_s20   ;;  %s2310_s19 = sphi %s2415_s19, %s3807_s19   ;;  %s2306_s18 = sphi %s2413_s18, %s3806_s18   ;;  %s2302_s17 = sphi %s2411_s17, %s3805_s17  }
   0xe   : > { %s2107_s28 = sadd.s32 4294967294, %s2338_s26   ;;  %s34_s29 = sadd.s32 1, %s2330_s24 }
   0xf   : > { %s37_s30 = sadd.s32 1, %s2334_s25  ;;  %p35_p0 = scmp.ge.s32.totalorder %s34_s29, 3 }
  0x10   : > { %s46_s12 = sadd.s32 1, %s2318_s21  ;;  %p53_p1 = scmp.ne.s32.totalorder %s2318_s21, %s2314_s20 }
  0x11   : > { %p54_p2 = scmp.eq.s32.totalorder %s2338_s26, 0  ;;  %s3815_s29 = smov (%p35_p0, %s34_s29), 0 }
  0x12   : > { %3755 = sst [smem:[#allocation10_spill]] %s3815_s29  ;;  %s3817_s30 = smov (!%p35_p0, %s37_s30), %s2334_s25 }
  0x13   : > { %s42_s13 = ssub.s32 %s2330_s24, %s3815_s29  ;;  %p2474_p3 = por %p54_p2, %p53_p1 }
  0x14   : > { %p39_p4 = scmp.ge.s32.totalorder %s3817_s30, 2  ;;  %s294_s15 = sadd.s32 1, %s2310_s19 }
  0x15   : > { %p304_p5 = scmp.ne.s32.totalorder %s2310_s19, %s2306_s18  ;;  %p305_p6 = scmp.eq.s32.totalorder %s2106_s27, 5 }
  0x16   : > { %s3819_s30 = smov (%p39_p4, %s3817_s30), 0  ;;  %p310_p8 = scmp.ne.s32.totalorder %s2306_s18, %s2302_s17 }
  0x17   : > { %3757 = sst [smem:[#allocation11_spill]] %s3819_s30  ;;  %p2483_p7 = por %p305_p6, %p304_p5 }
  0x18   : > { %s41_s11 = ssub.s32 %s2334_s25, %s3819_s30  ;;  %p311_p9 = scmp.eq.s32.totalorder %s2107_s28, 5 }
  0x19   : > { %s43_s29 = sor.u32 %s42_s13, %s41_s11  ;;  %p292_p10 = scmp.eq.s32.totalorder %s41_s11, 0 }
  0x1a   : > { %p44_p11 = scmp.eq.s32.totalorder %s43_s29, 0  ;;  %p2491_p12 = por %p311_p9, %p310_p8 }
  0x1b   : > { %s2496_s7 = scalar_select %p292_p10, %s2310_s19, %s294_s15  }
  0x1c   : > { %s3759_s9 = scalar_select %p2491_p12, 1, 0 }
  0x1d   : > { %s2499_s27 = scalar_select %p44_p11, %s2318_s21, %s46_s12  }
  0x1e   : > { %3760 = sst [smem:[#allocation12_spill]] %s3759_s9  ;;  %p2109_p13 = scmp.ge.s32.totalorder %s2338_s26, 6 }
  0x20   : > { %351 = sbr.rel (%p2109_p13) target bundleno = 121 (0x79), region = 48 }
  0x25   : > { %354 = sbr.rel (!%p2474_p3) target bundleno = 79 (0x4f), region = 52  ;;  %s356_s28 = sand.u32 (%p2474_p3), 1, %s2318_s21  }
  0x26   : > { %s2124_s11 = smul.u32 (%p2474_p3), 96, %s2334_s25  ;;  %s2110_s29 = sshll.u32 (%p2474_p3), %s356_s28, 8 }
  0x27   : > { %s3761_s0 = sld [smem:[#allocation29_spill]] (%p2474_p3)  ;;  %s2515_s12 = scalar_lea.vmem (%p2474_p3), [#allocation4], %s2110_s29 }
  0x28   : > { %s360_s13 = sadd.s32 (%p2474_p3), %s2330_s24, %s2124_s11 }
  0x29   : > { %s2111_s30 = sshll.u32 (%p2474_p3), %s360_s13, 3 }
  0x2d   : > { %s2510_s15 = scalar_lea.vmem %s3761_s0, %s2111_s30 }
  0x2e   : > { %v453_v0 = vld [vmem:[%s2510_s15] sm:$0xff]  ;;  %v455_v1 = vld [vmem:[%s2510_s15 + $0x18] sm:$0xff]  ;;  %v457_v2 = vld [vmem:[%s2510_s15 + $0x30] sm:$0xff] }
  0x2f   : > { %454 = vst [vmem:[%s2515_s12] sm:$0xff] %v453_v0  ;;  %v459_v3 = vld [vmem:[%s2510_s15 + $0x48] sm:$0xff]  ;;  %v461_v4 = vld [vmem:[%s2510_s15 + $0x60] sm:$0xff]  ;;  %v463_v5 = vld [vmem:[%s2510_s15 + $0x78] sm:$0xff] }
  0x30   : > { %456 = vst [vmem:[%s2515_s12 + $0x8] sm:$0xff] %v455_v1  ;;  %v465_v6 = vld [vmem:[%s2510_s15 + $0x90] sm:$0xff]  ;;  %v467_v7 = vld [vmem:[%s2510_s15 + $0xa8] sm:$0xff]  ;;  %v469_v8 = vld [vmem:[%s2510_s15 + $0xc0] sm:$0xff] }
  0x31   : > { %458 = vst [vmem:[%s2515_s12 + $0x10] sm:$0xff] %v457_v2  ;;  %v471_v9 = vld [vmem:[%s2510_s15 + $0xd8] sm:$0xff]  ;;  %v473_v10 = vld [vmem:[%s2510_s15 + $0xf0] sm:$0xff]  ;;  %v475_v11 = vld [vmem:[%s2510_s15 + $0x108] sm:$0xff] }
  0x32   : > { %460 = vst [vmem:[%s2515_s12 + $0x18] sm:$0xff] %v459_v3  ;;  %v477_v12 = vld [vmem:[%s2510_s15 + $0x120] sm:$0xff]  ;;  %v479_v13 = vld [vmem:[%s2510_s15 + $0x138] sm:$0xff]  ;;  %v481_v14 = vld [vmem:[%s2510_s15 + $0x150] sm:$0xff] }
  0x33   : > { %462 = vst [vmem:[%s2515_s12 + $0x20] sm:$0xff] %v461_v4  ;;  %v483_v15 = vld [vmem:[%s2510_s15 + $0x168] sm:$0xff]  ;;  %v485_v16 = vld [vmem:[%s2510_s15 + $0x180] sm:$0xff]  ;;  %v487_v17 = vld [vmem:[%s2510_s15 + $0x198] sm:$0xff] }
  0x34   : > { %464 = vst [vmem:[%s2515_s12 + $0x28] sm:$0xff] %v463_v5  ;;  %v489_v18 = vld [vmem:[%s2510_s15 + $0x1b0] sm:$0xff]  ;;  %v491_v19 = vld [vmem:[%s2510_s15 + $0x1c8] sm:$0xff]  ;;  %v493_v20 = vld [vmem:[%s2510_s15 + $0x1e0] sm:$0xff] }
  0x35   : > { %466 = vst [vmem:[%s2515_s12 + $0x30] sm:$0xff] %v465_v6  ;;  %v495_v21 = vld [vmem:[%s2510_s15 + $0x1f8] sm:$0xff]  ;;  %v497_v22 = vld [vmem:[%s2510_s15 + $0x210] sm:$0xff]  ;;  %v499_v23 = vld [vmem:[%s2510_s15 + $0x228] sm:$0xff] }
  0x36   : > { %468 = vst [vmem:[%s2515_s12 + $0x38] sm:$0xff] %v467_v7  ;;  %v501_v24 = vld [vmem:[%s2510_s15 + $0x240] sm:$0xff]  ;;  %v503_v25 = vld [vmem:[%s2510_s15 + $0x258] sm:$0xff]  ;;  %v505_v26 = vld [vmem:[%s2510_s15 + $0x270] sm:$0xff] }
  0x37   : > { %470 = vst [vmem:[%s2515_s12 + $0x40] sm:$0xff] %v469_v8  ;;  %v507_v27 = vld [vmem:[%s2510_s15 + $0x288] sm:$0xff]  ;;  %v509_v28 = vld [vmem:[%s2510_s15 + $0x2a0] sm:$0xff]  ;;  %v511_v29 = vld [vmem:[%s2510_s15 + $0x2b8] sm:$0xff] }
  0x38   : > { %472 = vst [vmem:[%s2515_s12 + $0x48] sm:$0xff] %v471_v9  ;;  %v513_v30 = vld [vmem:[%s2510_s15 + $0x2d0] sm:$0xff]  ;;  %v515_v31 = vld [vmem:[%s2510_s15 + $0x2e8] sm:$0xff] }
  0x39   : > { %474 = vst [vmem:[%s2515_s12 + $0x50] sm:$0xff] %v473_v10 }
  0x3a   : > { %476 = vst [vmem:[%s2515_s12 + $0x58] sm:$0xff] %v475_v11 }
  0x3b   : > { %478 = vst [vmem:[%s2515_s12 + $0x60] sm:$0xff] %v477_v12 }
  0x3c   : > { %480 = vst [vmem:[%s2515_s12 + $0x68] sm:$0xff] %v479_v13 }
  0x3d   : > { %482 = vst [vmem:[%s2515_s12 + $0x70] sm:$0xff] %v481_v14 }
  0x3e   : > { %484 = vst [vmem:[%s2515_s12 + $0x78] sm:$0xff] %v483_v15 }
  0x3f   : > { %486 = vst [vmem:[%s2515_s12 + $0x80] sm:$0xff] %v485_v16 }
  0x40   : > { %488 = vst [vmem:[%s2515_s12 + $0x88] sm:$0xff] %v487_v17 }
  0x41   : > { %490 = vst [vmem:[%s2515_s12 + $0x90] sm:$0xff] %v489_v18 }
  0x42   : > { %492 = vst [vmem:[%s2515_s12 + $0x98] sm:$0xff] %v491_v19 }
  0x43   : > { %494 = vst [vmem:[%s2515_s12 + $0xa0] sm:$0xff] %v493_v20 }
  0x44   : > { %496 = vst [vmem:[%s2515_s12 + $0xa8] sm:$0xff] %v495_v21 }
  0x45   : > { %498 = vst [vmem:[%s2515_s12 + $0xb0] sm:$0xff] %v497_v22 }
  0x46   : > { %500 = vst [vmem:[%s2515_s12 + $0xb8] sm:$0xff] %v499_v23 }
  0x47   : > { %502 = vst [vmem:[%s2515_s12 + $0xc0] sm:$0xff] %v501_v24 }
  0x48   : > { %504 = vst [vmem:[%s2515_s12 + $0xc8] sm:$0xff] %v503_v25 }
  0x49   : > { %506 = vst [vmem:[%s2515_s12 + $0xd0] sm:$0xff] %v505_v26 }
  0x4a   : > { %508 = vst [vmem:[%s2515_s12 + $0xd8] sm:$0xff] %v507_v27 }
  0x4b   : > { %510 = vst [vmem:[%s2515_s12 + $0xe0] sm:$0xff] %v509_v28 }
  0x4c   : > { %512 = vst [vmem:[%s2515_s12 + $0xe8] sm:$0xff] %v511_v29 }
  0x4d   : > { %514 = vst [vmem:[%s2515_s12 + $0xf0] sm:$0xff] %v513_v30 }
  0x4e   : > { %516 = vst [vmem:[%s2515_s12 + $0xf8] sm:$0xff] %v515_v31 }
  0x4f PF: > { %522 = sbr.rel (!%p2474_p3) target bundleno = 121 (0x79), region = 90  ;;  %s524_s9 = sand.u32 (%p2474_p3), 1, %s2318_s21  }
  0x50   : > { %s2125_s17 = smul.u32 (%p2474_p3), 96, %s2334_s25  ;;  %s2112_s30 = sshll.u32 (%p2474_p3), %s524_s9, 8 }
  0x51   : > { %s3762_s1 = sld [smem:[#allocation30_spill]] (%p2474_p3)  ;;  %s2591_s14 = scalar_lea.vmem (%p2474_p3), [#allocation5], %s2112_s30 }
  0x52   : > { %s528_s28 = sadd.s32 (%p2474_p3), %s2330_s24, %s2125_s17 }
  0x53   : > { %s2113_s11 = sshll.u32 (%p2474_p3), %s528_s28, 3 }
  0x57   : > { %s2586_s0 = scalar_lea.vmem %s3762_s1, %s2113_s11 }
  0x58   : > { %v621_v32 = vld [vmem:[%s2586_s0] sm:$0xff]  ;;  %v623_v33 = vld [vmem:[%s2586_s0 + $0x18] sm:$0xff]  ;;  %v625_v34 = vld [vmem:[%s2586_s0 + $0x30] sm:$0xff] }
  0x59   : > { %622 = vst [vmem:[%s2591_s14] sm:$0xff] %v621_v32  ;;  %v627_v35 = vld [vmem:[%s2586_s0 + $0x48] sm:$0xff]  ;;  %v629_v36 = vld [vmem:[%s2586_s0 + $0x60] sm:$0xff]  ;;  %v631_v37 = vld [vmem:[%s2586_s0 + $0x78] sm:$0xff] }
  0x5a   : > { %624 = vst [vmem:[%s2591_s14 + $0x8] sm:$0xff] %v623_v33  ;;  %v633_v38 = vld [vmem:[%s2586_s0 + $0x90] sm:$0xff]  ;;  %v635_v39 = vld [vmem:[%s2586_s0 + $0xa8] sm:$0xff]  ;;  %v637_v40 = vld [vmem:[%s2586_s0 + $0xc0] sm:$0xff] }
  0x5b   : > { %626 = vst [vmem:[%s2591_s14 + $0x10] sm:$0xff] %v625_v34  ;;  %v639_v41 = vld [vmem:[%s2586_s0 + $0xd8] sm:$0xff]  ;;  %v641_v42 = vld [vmem:[%s2586_s0 + $0xf0] sm:$0xff]  ;;  %v643_v43 = vld [vmem:[%s2586_s0 + $0x108] sm:$0xff] }
  0x5c   : > { %628 = vst [vmem:[%s2591_s14 + $0x18] sm:$0xff] %v627_v35  ;;  %v645_v44 = vld [vmem:[%s2586_s0 + $0x120] sm:$0xff]  ;;  %v647_v45 = vld [vmem:[%s2586_s0 + $0x138] sm:$0xff]  ;;  %v649_v46 = vld [vmem:[%s2586_s0 + $0x150] sm:$0xff] }
  0x5d   : > { %630 = vst [vmem:[%s2591_s14 + $0x20] sm:$0xff] %v629_v36  ;;  %v651_v47 = vld [vmem:[%s2586_s0 + $0x168] sm:$0xff]  ;;  %v653_v48 = vld [vmem:[%s2586_s0 + $0x180] sm:$0xff]  ;;  %v655_v49 = vld [vmem:[%s2586_s0 + $0x198] sm:$0xff] }
  0x5e   : > { %632 = vst [vmem:[%s2591_s14 + $0x28] sm:$0xff] %v631_v37  ;;  %v657_v50 = vld [vmem:[%s2586_s0 + $0x1b0] sm:$0xff]  ;;  %v659_v51 = vld [vmem:[%s2586_s0 + $0x1c8] sm:$0xff]  ;;  %v661_v52 = vld [vmem:[%s2586_s0 + $0x1e0] sm:$0xff] }
  0x5f   : > { %634 = vst [vmem:[%s2591_s14 + $0x30] sm:$0xff] %v633_v38  ;;  %v663_v53 = vld [vmem:[%s2586_s0 + $0x1f8] sm:$0xff]  ;;  %v665_v54 = vld [vmem:[%s2586_s0 + $0x210] sm:$0xff]  ;;  %v667_v55 = vld [vmem:[%s2586_s0 + $0x228] sm:$0xff] }
  0x60   : > { %636 = vst [vmem:[%s2591_s14 + $0x38] sm:$0xff] %v635_v39  ;;  %v669_v56 = vld [vmem:[%s2586_s0 + $0x240] sm:$0xff]  ;;  %v671_v57 = vld [vmem:[%s2586_s0 + $0x258] sm:$0xff]  ;;  %v673_v58 = vld [vmem:[%s2586_s0 + $0x270] sm:$0xff] }
  0x61   : > { %638 = vst [vmem:[%s2591_s14 + $0x40] sm:$0xff] %v637_v40  ;;  %v675_v59 = vld [vmem:[%s2586_s0 + $0x288] sm:$0xff]  ;;  %v677_v60 = vld [vmem:[%s2586_s0 + $0x2a0] sm:$0xff]  ;;  %v679_v61 = vld [vmem:[%s2586_s0 + $0x2b8] sm:$0xff] }
  0x62   : > { %640 = vst [vmem:[%s2591_s14 + $0x48] sm:$0xff] %v639_v41  ;;  %v681_v62 = vld [vmem:[%s2586_s0 + $0x2d0] sm:$0xff]  ;;  %v683_v63 = vld [vmem:[%s2586_s0 + $0x2e8] sm:$0xff] }
  0x63   : > { %642 = vst [vmem:[%s2591_s14 + $0x50] sm:$0xff] %v641_v42 }
  0x64   : > { %644 = vst [vmem:[%s2591_s14 + $0x58] sm:$0xff] %v643_v43 }
  0x65   : > { %646 = vst [vmem:[%s2591_s14 + $0x60] sm:$0xff] %v645_v44 }
  0x66   : > { %648 = vst [vmem:[%s2591_s14 + $0x68] sm:$0xff] %v647_v45 }
  0x67   : > { %650 = vst [vmem:[%s2591_s14 + $0x70] sm:$0xff] %v649_v46 }
  0x68   : > { %652 = vst [vmem:[%s2591_s14 + $0x78] sm:$0xff] %v651_v47 }
  0x69   : > { %654 = vst [vmem:[%s2591_s14 + $0x80] sm:$0xff] %v653_v48 }
  0x6a   : > { %656 = vst [vmem:[%s2591_s14 + $0x88] sm:$0xff] %v655_v49 }
  0x6b   : > { %658 = vst [vmem:[%s2591_s14 + $0x90] sm:$0xff] %v657_v50 }
  0x6c   : > { %660 = vst [vmem:[%s2591_s14 + $0x98] sm:$0xff] %v659_v51 }
  0x6d   : > { %662 = vst [vmem:[%s2591_s14 + $0xa0] sm:$0xff] %v661_v52 }
  0x6e   : > { %664 = vst [vmem:[%s2591_s14 + $0xa8] sm:$0xff] %v663_v53 }
  0x6f   : > { %666 = vst [vmem:[%s2591_s14 + $0xb0] sm:$0xff] %v665_v54 }
  0x70   : > { %668 = vst [vmem:[%s2591_s14 + $0xb8] sm:$0xff] %v667_v55 }
  0x71   : > { %670 = vst [vmem:[%s2591_s14 + $0xc0] sm:$0xff] %v669_v56 }
  0x72   : > { %672 = vst [vmem:[%s2591_s14 + $0xc8] sm:$0xff] %v671_v57 }
  0x73   : > { %674 = vst [vmem:[%s2591_s14 + $0xd0] sm:$0xff] %v673_v58 }
  0x74   : > { %676 = vst [vmem:[%s2591_s14 + $0xd8] sm:$0xff] %v675_v59 }
  0x75   : > { %678 = vst [vmem:[%s2591_s14 + $0xe0] sm:$0xff] %v677_v60 }
  0x76   : > { %680 = vst [vmem:[%s2591_s14 + $0xe8] sm:$0xff] %v679_v61 }
  0x77   : > { %682 = vst [vmem:[%s2591_s14 + $0xf0] sm:$0xff] %v681_v62 }
  0x78   : > { %684 = vst [vmem:[%s2591_s14 + $0xf8] sm:$0xff] %v683_v63 }
  0x79 PF: > { %p2114_p0 = scmp.ge.s32.totalorder %s2338_s26, 1  ;;  %p689_p1 = scmp.lt.s32.totalorder %s2338_s26, 7 }
  0x7b   : > { %p690_p2 = pnand %p2114_p0, %p689_p1 }
  0x7d   : > { %693 = sbr.rel (%p690_p2) target bundleno = 1663 (0x67f), region = 128 }
  0x82   : > { %s696_s15 = sand.u32 1, %s2314_s20   ;;  %s3747_s12 = sand.u32 1, %s2306_s18   ;;  %v751_v0 = vlaneseq }
  0x83   : > { %s2658_s0 = sshll.u32 %s696_s15, 8  ;;  %p748_p3 = scmp.lt.s32.totalorder %s2326_s23, 1 }
  0x84   : > { %v2660_v1 = vand.u32 127, %v751_v0  ;;  %s2117_s9 = sshll.u32 %s2322_s22, 7  ;;  %s2665_s17 = scalar_lea.vmem [#allocation4], %s2658_s0 }
  0x85   : > { %v757_v2 = vld [vmem:[%s2665_s17] sm:$0xff]  ;;  %v758_v3 = vld [vmem:[%s2665_s17 + $0x8] sm:$0xff]  ;;  %v759_v4 = vld [vmem:[%s2665_s17 + $0x10] sm:$0xff]  ;;  %v754_v5 = vstv %s2117_s9  ;;  %s2674_s20 = scalar_select %p748_p3, %s2326_s23, 1 }
  0x86   : > { %3763 = vst [vmem:[#allocation13_spill] sm:$0xff] %v2660_v1  ;;  %v760_v6 = vld [vmem:[%s2665_s17 + $0x18] sm:$0xff]  ;;  %v761_v7 = vld [vmem:[%s2665_s17 + $0x20] sm:$0xff]  ;;  %v762_v8 = vld [vmem:[%s2665_s17 + $0x28] sm:$0xff]  ;;  %v2677_v9 = vadd.s32 %v754_v5, %v2660_v1  ;;  %s2803_s29 = scalar_lea.vmem [#allocation5], %s2658_s0  ;;  %s3003_s13 = scalar_lea.vmem [#allocation6], %s3747_s12 }
  0x87   : > { %v763_v10 = vld [vmem:[%s2665_s17 + $0x30] sm:$0xff]  ;;  %v764_v11 = vld [vmem:[%s2665_s17 + $0x38] sm:$0xff]  ;;  %v765_v12 = vld [vmem:[%s2665_s17 + $0x40] sm:$0xff]  ;;  %s750_s11 = scalar_lea.vmem %s3738_s10, %s2674_s20  ;;  %p2118_p4 = scmp.ne.s32.totalorder %s2322_s22, 0 }
  0x88   : > { %v766_v13 = vld [vmem:[%s2665_s17 + $0x48] sm:$0xff]  ;;  %v767_v14 = vld [vmem:[%s2665_s17 + $0x50] sm:$0xff]  ;;  %v768_v15 = vld [vmem:[%s2665_s17 + $0x58] sm:$0xff]  ;;  %vm756_vm0 = vcmp.lt.s32.totalorder %v2677_v9, 300 }
  0x89   : > { %v769_v16 = vld [vmem:[%s2665_s17 + $0x60] sm:$0xff]  ;;  %v770_v17 = vld [vmem:[%s2665_s17 + $0x68] sm:$0xff]  ;;  %v771_v18 = vld [vmem:[%s2665_s17 + $0x70] sm:$0xff]  ;;  %v2698_v22 = vsel %vm756_vm0, %v757_v2, -inf  ;;  %v2702_v23 = vsel %vm756_vm0, %v758_v3, -inf  ;;  %v2706_v24 = vsel %vm756_vm0, %v759_v4, -inf }
  0x8a   : > { %v772_v19 = vld [vmem:[%s2665_s17 + $0x78] sm:$0xff]  ;;  %v773_v20 = vld [vmem:[%s2665_s17 + $0x80] sm:$0xff]  ;;  %v774_v21 = vld [vmem:[%s2665_s17 + $0x88] sm:$0xff]  ;;  %v2713_v28 = vsel %vm756_vm0, %v760_v6, -inf  ;;  %v2717_v29 = vsel %vm756_vm0, %v761_v7, -inf  ;;  %v2721_v30 = vsel %vm756_vm0, %v762_v8, -inf }
  0x8b   : > { %v775_v25 = vld [vmem:[%s2665_s17 + $0x90] sm:$0xff]  ;;  %v776_v26 = vld [vmem:[%s2665_s17 + $0x98] sm:$0xff]  ;;  %v777_v27 = vld [vmem:[%s2665_s17 + $0xa0] sm:$0xff]  ;;  %v2728_v34 = vsel %vm756_vm0, %v763_v10, -inf  ;;  %v2732_v35 = vsel %vm756_vm0, %v764_v11, -inf  ;;  %v2736_v36 = vsel %vm756_vm0, %v765_v12, -inf }
  0x8c   : > { %v778_v31 = vld [vmem:[%s2665_s17 + $0xa8] sm:$0xff]  ;;  %v779_v32 = vld [vmem:[%s2665_s17 + $0xb0] sm:$0xff]  ;;  %v780_v33 = vld [vmem:[%s2665_s17 + $0xb8] sm:$0xff]  ;;  %v2743_v40 = vsel %vm756_vm0, %v766_v13, -inf  ;;  %v2747_v41 = vsel %vm756_vm0, %v767_v14, -inf  ;;  %v2751_v42 = vsel %vm756_vm0, %v768_v15, -inf }
  0x8d   : > { %v781_v37 = vld [vmem:[%s2665_s17 + $0xc0] sm:$0xff]  ;;  %v782_v38 = vld [vmem:[%s2665_s17 + $0xc8] sm:$0xff]  ;;  %v783_v39 = vld [vmem:[%s2665_s17 + $0xd0] sm:$0xff]  ;;  %v2758_v46 = vsel %vm756_vm0, %v769_v16, -inf  ;;  %v2762_v47 = vsel %vm756_vm0, %v770_v17, -inf  ;;  %v2766_v48 = vsel %vm756_vm0, %v771_v18, -inf }
  0x8e   : > { %v784_v43 = vld [vmem:[%s2665_s17 + $0xd8] sm:$0xff]  ;;  %v785_v44 = vld [vmem:[%s2665_s17 + $0xe0] sm:$0xff]  ;;  %v786_v45 = vld [vmem:[%s2665_s17 + $0xe8] sm:$0xff]  ;;  %v2772_v51 = vsel %vm756_vm0, %v772_v19, -inf  ;;  %v2776_v52 = vsel %vm756_vm0, %v773_v20, -inf  ;;  %v2780_v53 = vsel %vm756_vm0, %v774_v21, -inf }
  0x8f   : > { %v787_v49 = vld [vmem:[%s2665_s17 + $0xf0] sm:$0xff]  ;;  %v788_v50 = vld [vmem:[%s2665_s17 + $0xf8] sm:$0xff]  ;;  %v2784_v54 = vsel %vm756_vm0, %v775_v25, -inf  ;;  %v2788_v55 = vsel %vm756_vm0, %v776_v26, -inf  ;;  %v2792_v56 = vsel %vm756_vm0, %v777_v27, -inf  ;;  %v2796_v57 = vsel %vm756_vm0, %v778_v31, -inf }
  0x90   : > { %v2800_v58 = vsel %vm756_vm0, %v779_v32, -inf  ;;  %v823_v59 = vld [vmem:[%s2803_s29] sm:$0xff]  ;;  %v824_v60 = vld [vmem:[%s2803_s29 + $0x8] sm:$0xff]  ;;  %v2809_v61 = vsel %vm756_vm0, %v780_v33, -inf  ;;  %v2813_v62 = vsel %vm756_vm0, %v781_v37, -inf  ;;  %v2817_v63 = vsel %vm756_vm0, %v782_v38, -inf }
  0x91   : > { %v2821_v0 = vsel %vm756_vm0, %v783_v39, -inf  ;;  %v825_v2 = vld [vmem:[%s2803_s29 + $0x10] sm:$0xff]  ;;  %v826_v3 = vld [vmem:[%s2803_s29 + $0x18] sm:$0xff]  ;;  %v2827_v4 = vsel %vm756_vm0, %v784_v43, -inf  ;;  %v2831_v5 = vsel %vm756_vm0, %v785_v44, -inf  ;;  %v2835_v6 = vsel %vm756_vm0, %v786_v45, -inf }
  0x92   : > { %v2839_v7 = vsel %vm756_vm0, %v787_v49, -inf  ;;  %v827_v8 = vld [vmem:[%s2803_s29 + $0x20] sm:$0xff]  ;;  %v828_v10 = vld [vmem:[%s2803_s29 + $0x28] sm:$0xff]  ;;  %v2845_v11 = vsel %vm756_vm0, %v788_v50, -inf  ;;  %v829_v12 = vld [vmem:[%s2803_s29 + $0x30] sm:$0xff]  ;;  %v2852_v15 = vsel %vm756_vm0, %v823_v59, -inf }
  0x93   : > { %v830_v13 = vld [vmem:[%s2803_s29 + $0x38] sm:$0xff]  ;;  %v831_v14 = vld [vmem:[%s2803_s29 + $0x40] sm:$0xff]  ;;  %v2856_v16 = vsel %vm756_vm0, %v824_v60, -inf  ;;  %v832_v17 = vld [vmem:[%s2803_s29 + $0x48] sm:$0xff]  ;;  %v2863_v20 = vsel %vm756_vm0, %v825_v2, -inf  ;;  %v2867_v21 = vsel %vm756_vm0, %v826_v3, -inf }
  0x94   : > { %v833_v18 = vld [vmem:[%s2803_s29 + $0x50] sm:$0xff]  ;;  %v834_v19 = vld [vmem:[%s2803_s29 + $0x58] sm:$0xff]  ;;  %v2871_v25 = vsel %vm756_vm0, %v827_v8, -inf  ;;  %v835_v26 = vld [vmem:[%s2803_s29 + $0x60] sm:$0xff]  ;;  %v2878_v32 = vsel %vm756_vm0, %v828_v10, -inf  ;;  %v2882_v33 = vsel %vm756_vm0, %v829_v12, -inf }
  0x95   : > { %v836_v27 = vld [vmem:[%s2803_s29 + $0x68] sm:$0xff]  ;;  %v837_v31 = vld [vmem:[%s2803_s29 + $0x70] sm:$0xff]  ;;  %v2886_v37 = vsel %vm756_vm0, %v830_v13, -inf  ;;  %v838_v38 = vld [vmem:[%s2803_s29 + $0x78] sm:$0xff]  ;;  %v2893_v44 = vsel %vm756_vm0, %v831_v14, -inf  ;;  %v2897_v45 = vsel %vm756_vm0, %v832_v17, -inf }
  0x96   : > { %v839_v39 = vld [vmem:[%s2803_s29 + $0x80] sm:$0xff]  ;;  %v840_v43 = vld [vmem:[%s2803_s29 + $0x88] sm:$0xff]  ;;  %v2901_v49 = vsel %vm756_vm0, %v833_v18, -inf  ;;  %v841_v50 = vld [vmem:[%s2803_s29 + $0x90] sm:$0xff]  ;;  %v2908_v2 = vsel %vm756_vm0, %v834_v19, -inf  ;;  %v2912_v3 = vsel %vm756_vm0, %v835_v26, -inf }
  0x97   : > { %v842_v59 = vld [vmem:[%s2803_s29 + $0x98] sm:$0xff]  ;;  %v843_v60 = vld [vmem:[%s2803_s29 + $0xa0] sm:$0xff]  ;;  %v2916_v8 = vsel %vm756_vm0, %v836_v27, -inf  ;;  %v844_v10 = vld [vmem:[%s2803_s29 + $0xa8] sm:$0xff]  ;;  %v2923_v14 = vsel %vm756_vm0, %v837_v31, -inf  ;;  %v2927_v17 = vsel %vm756_vm0, %v838_v38, -inf }
  0x98   : > { %v845_v12 = vld [vmem:[%s2803_s29 + $0xb0] sm:$0xff]  ;;  %v846_v13 = vld [vmem:[%s2803_s29 + $0xb8] sm:$0xff]  ;;  %3764 = vst [vmem:[#allocation14_spill] sm:$0xff] %v2923_v14  ;;  %v2931_v18 = vsel %vm756_vm0, %v839_v39, -inf  ;;  %v847_v19 = vld [vmem:[%s2803_s29 + $0xc0] sm:$0xff]  ;;  %v2938_v1 = vsel %vm756_vm0, %v840_v43, -inf }
  0x99   : > { %3765 = vst [vmem:[#allocation15_spill] sm:$0xff] %v2927_v17  ;;  %v848_v26 = vld [vmem:[%s2803_s29 + $0xc8] sm:$0xff]  ;;  %v849_v27 = vld [vmem:[%s2803_s29 + $0xd0] sm:$0xff]  ;;  %v2942_v31 = vsel %vm756_vm0, %v841_v50, -inf  ;;  %v2946_v14 = vsel %vm756_vm0, %v842_v59, -inf  ;;  %v850_v38 = vld [vmem:[%s2803_s29 + $0xd8] sm:$0xff] }
  0x9a   : > { %3766 = vst [vmem:[#allocation16_spill] sm:$0xff] %v2931_v18  ;;  %v851_v17 = vld [vmem:[%s2803_s29 + $0xe0] sm:$0xff]  ;;  %v852_v39 = vld [vmem:[%s2803_s29 + $0xe8] sm:$0xff]  ;;  %v2953_v18 = vsel %vm756_vm0, %v843_v60, -inf  ;;  %v2957_v43 = vsel %vm756_vm0, %v844_v10, -inf  ;;  %v2961_v50 = vsel %vm756_vm0, %v845_v12, -inf }
  0x9b   : > { %3767 = vst [vmem:[#allocation17_spill] sm:$0xff] %v2938_v1  ;;  %v854_v1 = vld [vmem:[%s2803_s29 + $0xf8] sm:$0xff]  ;;  %v2967_v59 = vsel %vm756_vm0, %v846_v13, -inf  ;;  %v2975_v60 = vsel %vm756_vm0, %v848_v26, -inf  ;;  %v2979_v10 = vsel %vm756_vm0, %v849_v27, -inf  ;;  %v2983_v12 = vsel %vm756_vm0, %v850_v38, -inf }
  0x9c   : > { %3768 = vst [vmem:[#allocation18_spill] sm:$0xff] %v2942_v31  ;;  %v853_v31 = vld [vmem:[%s2803_s29 + $0xf0] sm:$0xff]  ;;  %v2987_v13 = vsel %vm756_vm0, %v851_v17, -inf  ;;  %v2999_v27 = vsel %vm756_vm0, %v854_v1, -inf }
  0x9d   : > { %3769 = vst [vmem:[#allocation19_spill] sm:$0xff] %v2946_v14  ;;  %v2971_v14 = vsel %vm756_vm0, %v847_v19, -inf  ;;  %v2991_v19 = vsel %vm756_vm0, %v852_v39, -inf  ;;  %v2995_v26 = vsel %vm756_vm0, %v853_v31, -inf }
  0x9e   : > { %3770 = vst [vmem:[#allocation20_spill] sm:$0xff] %v2967_v59 }
  0x9f   : > { %3771 = vst [vmem:[#allocation21_spill] sm:$0xff] %v2971_v14 }
  0xa0   : > { %3772 = vst [vmem:[#allocation22_spill] sm:$0xff] %v2975_v60 }
  0xa1   : > { %3773 = vst [vmem:[#allocation23_spill] sm:$0xff] %v2979_v10 }
  0xa2   : > { %3774 = vst [vmem:[#allocation24_spill] sm:$0xff] %v2983_v12  ;;  %890 = sbr.rel (%p2118_p4) target bundleno = 232 (0xe8), region = 140 }
  0xa3   : > { %3775 = vst [vmem:[#allocation25_spill] sm:$0xff] %v2987_v13 }
  0xa4   : > { %3776 = vst [vmem:[#allocation26_spill] sm:$0xff] %v2991_v19 }
  0xa5   : > { %3777 = vst [vmem:[#allocation27_spill] sm:$0xff] %v2995_v26 }
  0xa6   : > { %3778 = vst [vmem:[#allocation28_spill] sm:$0xff] %v2999_v27 }
  0xa7   : > { %v2340_v17 = vmov -inf  }
  0xa8   : > { %891 = vst [vmem:[#allocation2 + $0xb0] sm:$0xff] %v2340_v17 }
  0xa9   : > { %892 = vst [vmem:[#allocation2] sm:$0xff] %v2340_v17 }
  0xaa   : > { %893 = vst [vmem:[#allocation2 + $0xd8] sm:$0xff] %v2340_v17 }
  0xab   : > { %894 = vst [vmem:[#allocation2 + $0x18] sm:$0xff] %v2340_v17 }
  0xac   : > { %895 = vst [vmem:[#allocation2 + $0x50] sm:$0xff] %v2340_v17 }
  0xad   : > { %896 = vst [vmem:[#allocation2 + $0x68] sm:$0xff] %v2340_v17 }
  0xae   : > { %897 = vst [vmem:[#allocation2 + $0x30] sm:$0xff] %v2340_v17 }
  0xaf   : > { %898 = vst [vmem:[#allocation2 + $0x48] sm:$0xff] %v2340_v17 }
  0xb0   : > { %899 = vst [vmem:[#allocation2 + $0x80] sm:$0xff] %v2340_v17 }
  0xb1   : > { %900 = vst [vmem:[#allocation2 + $0x88] sm:$0xff] %v2340_v17 }
  0xb2   : > { %901 = vst [vmem:[#allocation2 + $0xe8] sm:$0xff] %v2340_v17 }
  0xb3   : > { %902 = vst [vmem:[#allocation2 + $0xb8] sm:$0xff] %v2340_v17 }
  0xb4   : > { %903 = vst [vmem:[#allocation2 + $0x60] sm:$0xff] %v2340_v17 }
  0xb5   : > { %904 = vst [vmem:[#allocation2 + $0xf0] sm:$0xff] %v2340_v17 }
  0xb6   : > { %905 = vst [vmem:[#allocation2 + $0x8] sm:$0xff] %v2340_v17 }
  0xb7   : > { %906 = vst [vmem:[#allocation2 + $0x78] sm:$0xff] %v2340_v17 }
  0xb8   : > { %907 = vst [vmem:[#allocation2 + $0x38] sm:$0xff] %v2340_v17 }
  0xb9   : > { %908 = vst [vmem:[#allocation2 + $0x58] sm:$0xff] %v2340_v17 }
  0xba   : > { %909 = vst [vmem:[#allocation2 + $0x40] sm:$0xff] %v2340_v17 }
  0xbb   : > { %910 = vst [vmem:[#allocation2 + $0xc8] sm:$0xff] %v2340_v17 }
  0xbc   : > { %911 = vst [vmem:[#allocation2 + $0xe0] sm:$0xff] %v2340_v17 }
  0xbd   : > { %912 = vst [vmem:[#allocation2 + $0x90] sm:$0xff] %v2340_v17 }
  0xbe   : > { %913 = vst [vmem:[#allocation2 + $0x70] sm:$0xff] %v2340_v17 }
  0xbf   : > { %914 = vst [vmem:[#allocation2 + $0xc0] sm:$0xff] %v2340_v17 }
  0xc0   : > { %915 = vst [vmem:[#allocation2 + $0xa8] sm:$0xff] %v2340_v17 }
  0xc1   : > { %916 = vst [vmem:[#allocation2 + $0xd0] sm:$0xff] %v2340_v17 }
  0xc2   : > { %917 = vst [vmem:[#allocation2 + $0x10] sm:$0xff] %v2340_v17 }
  0xc3   : > { %918 = vst [vmem:[#allocation2 + $0x28] sm:$0xff] %v2340_v17 }
  0xc4   : > { %919 = vst [vmem:[#allocation2 + $0xa0] sm:$0xff] %v2340_v17 }
  0xc5   : > { %920 = vst [vmem:[#allocation2 + $0xf8] sm:$0xff] %v2340_v17 }
  0xc6   : > { %921 = vst [vmem:[#allocation2 + $0x20] sm:$0xff] %v2340_v17 }
  0xc7   : > { %922 = vst [vmem:[#allocation2 + $0x98] sm:$0xff] %v2340_v17 }
  0xc8   : > { %923 = vst [vmem:[#allocation3 + $0x80] sm:$0xff] %v2340_v17 }
  0xc9   : > { %924 = vst [vmem:[#allocation3 + $0xc8] sm:$0xff] %v2340_v17 }
  0xca   : > { %925 = vst [vmem:[#allocation3 + $0xe8] sm:$0xff] %v2340_v17 }
  0xcb   : > { %926 = vst [vmem:[#allocation3 + $0x78] sm:$0xff] %v2340_v17 }
  0xcc   : > { %927 = vst [vmem:[#allocation3 + $0x8] sm:$0xff] %v2340_v17 }
  0xcd   : > { %928 = vst [vmem:[#allocation3 + $0x90] sm:$0xff] %v2340_v17 }
  0xce   : > { %929 = vst [vmem:[#allocation3 + $0x58] sm:$0xff] %v2340_v17 }
  0xcf   : > { %930 = vst [vmem:[#allocation3 + $0xa8] sm:$0xff] %v2340_v17 }
  0xd0   : > { %931 = vst [vmem:[#allocation3 + $0xd0] sm:$0xff] %v2340_v17 }
  0xd1   : > { %932 = vst [vmem:[#allocation3 + $0xb0] sm:$0xff] %v2340_v17 }
  0xd2   : > { %933 = vst [vmem:[#allocation3 + $0x38] sm:$0xff] %v2340_v17 }
  0xd3   : > { %934 = vst [vmem:[#allocation3 + $0x40] sm:$0xff] %v2340_v17 }
  0xd4   : > { %935 = vst [vmem:[#allocation3 + $0xe0] sm:$0xff] %v2340_v17 }
  0xd5   : > { %936 = vst [vmem:[#allocation3 + $0x60] sm:$0xff] %v2340_v17 }
  0xd6   : > { %937 = vst [vmem:[#allocation3 + $0x18] sm:$0xff] %v2340_v17 }
  0xd7   : > { %938 = vst [vmem:[#allocation3 + $0x68] sm:$0xff] %v2340_v17 }
  0xd8   : > { %939 = vst [vmem:[#allocation3 + $0x10] sm:$0xff] %v2340_v17 }
  0xd9   : > { %940 = vst [vmem:[#allocation3 + $0x70] sm:$0xff] %v2340_v17 }
  0xda   : > { %941 = vst [vmem:[#allocation3 + $0x50] sm:$0xff] %v2340_v17 }
  0xdb   : > { %942 = vst [vmem:[#allocation3 + $0xa0] sm:$0xff] %v2340_v17 }
  0xdc   : > { %943 = vst [vmem:[#allocation3 + $0xd8] sm:$0xff] %v2340_v17 }
  0xdd   : > { %944 = vst [vmem:[#allocation3 + $0x30] sm:$0xff] %v2340_v17 }
  0xde   : > { %945 = vst [vmem:[#allocation3 + $0x20] sm:$0xff] %v2340_v17 }
  0xdf   : > { %946 = vst [vmem:[#allocation3 + $0xf0] sm:$0xff] %v2340_v17 }
  0xe0   : > { %947 = vst [vmem:[#allocation3 + $0x88] sm:$0xff] %v2340_v17 }
  0xe1   : > { %948 = vst [vmem:[#allocation3 + $0x48] sm:$0xff] %v2340_v17 }
  0xe2   : > { %949 = vst [vmem:[#allocation3 + $0xf8] sm:$0xff] %v2340_v17 }
  0xe3   : > { %950 = vst [vmem:[#allocation3 + $0xc0] sm:$0xff] %v2340_v17 }
  0xe4   : > { %951 = vst [vmem:[#allocation3 + $0xb8] sm:$0xff] %v2340_v17 }
  0xe5   : > { %952 = vst [vmem:[#allocation3] sm:$0xff] %v2340_v17 }
  0xe6   : > { %953 = vst [vmem:[#allocation3 + $0x28] sm:$0xff] %v2340_v17 }
  0xe7   : > { %954 = vst [vmem:[#allocation3 + $0x98] sm:$0xff] %v2340_v17 }
  0xe8 PF: > { %v955_v1 = vld [vmem:[#allocation2 + $0xb0] sm:$0xff]  ;;  %v956_v9 = vld [vmem:[#allocation2] sm:$0xff]  ;;  %v957_v31 = vld [vmem:[#allocation2 + $0xd8] sm:$0xff]  ;;  %p2119_p5 = scmp.ne.s32.totalorder %s2322_s22, 2 }
  0xe9   : > { %v987_v38 = vmax.f32 %v955_v1, %v2698_v22  ;;  %v988_v39 = vmax.f32 %v956_v9, %v2702_v23  ;;  %v989_v27 = vmax.f32 %v957_v31, %v2706_v24  ;;  %v958_v26 = vld [vmem:[#allocation2 + $0x18] sm:$0xff]  ;;  %v959_v19 = vld [vmem:[#allocation2 + $0x50] sm:$0xff]  ;;  %v960_v13 = vld [vmem:[#allocation2 + $0x68] sm:$0xff]  ;;  %s3795_s2 = sld [smem:[#allocation31_spill]] (!%p2119_p5)  ;;  %s2341_s30 = smov (!%p2119_p5), 3  }
  0xea   : > { %v990_v12 = vmax.f32 %v958_v26, %v2713_v28  ;;  %v961_v10 = vld [vmem:[#allocation2 + $0x30] sm:$0xff]  ;;  %v991_v60 = vmax.f32 %v959_v19, %v2717_v29  ;;  %v962_v17 = vld [vmem:[#allocation2 + $0x48] sm:$0xff]  ;;  %v992_v14 = vmax.f32 %v960_v13, %v2721_v30  ;;  %v963_v59 = vld [vmem:[#allocation2 + $0x80] sm:$0xff]  ;;  %s3796_s15 = sld [smem:[#allocation32_spill]] (!%p2119_p5)  ;;  %s2342_s28 = smov (!%p2119_p5), 126  }
  0xeb   : > { %1019 = vst [vmem:[#allocation2 + $0xb0] sm:$0xff] %v987_v38  ;;  %v993_v22 = vmax.f32 %v961_v10, %v2728_v34  ;;  %v964_v23 = vld [vmem:[#allocation2 + $0x88] sm:$0xff]  ;;  %v994_v24 = vmax.f32 %v962_v17, %v2732_v35  ;;  %v995_v28 = vmax.f32 %v963_v59, %v2736_v36  ;;  %v966_v26 = vld [vmem:[#allocation2 + $0xb8] sm:$0xff]  ;;  %v967_v19 = vld [vmem:[#allocation2 + $0x60] sm:$0xff]  ;;  %s3797_s17 = sld [smem:[#allocation33_spill]] (!%p2119_p5)  ;;  %s2343_s12 = smov (!%p2119_p5), 1  }
  0xec   : > { %1020 = vst [vmem:[#allocation2] sm:$0xff] %v988_v39  ;;  %v965_v1 = vld [vmem:[#allocation2 + $0xe8] sm:$0xff]  ;;  %v996_v29 = vmax.f32 %v964_v23, %v2743_v40  ;;  %v968_v13 = vld [vmem:[#allocation2 + $0xf0] sm:$0xff]  ;;  %v998_v34 = vmax.f32 %v966_v26, %v2751_v42  ;;  %v999_v35 = vmax.f32 %v967_v19, %v2758_v46  ;;  %v971_v59 = vld [vmem:[#allocation2 + $0x38] sm:$0xff]  ;;  %s2344_s29 = smov (!%p2119_p5), 127   ;;  %s2345_s22 = smov (!%p2119_p5), 2  }
  0xed   : > { %1021 = vst [vmem:[#allocation2 + $0xd8] sm:$0xff] %v989_v27  ;;  %v997_v30 = vmax.f32 %v965_v1, %v2747_v41  ;;  %v969_v10 = vld [vmem:[#allocation2 + $0x8] sm:$0xff]  ;;  %v1000_v36 = vmax.f32 %v968_v13, %v2762_v47  ;;  %v1003_v42 = vmax.f32 %v971_v59, %v2776_v52  ;;  %v975_v9 = vld [vmem:[#allocation2 + $0xe0] sm:$0xff]  ;;  %v976_v31 = vld [vmem:[#allocation2 + $0x90] sm:$0xff]  ;;  %s2346_s14 = smov (!%p2119_p5), 125   ;;  %s2348_s0 = smov (!%p2119_p5), 5  }
  0xee   : > { %1022 = vst [vmem:[#allocation2 + $0x18] sm:$0xff] %v990_v12  ;;  %v970_v12 = vld [vmem:[#allocation2 + $0x78] sm:$0xff]  ;;  %v1001_v40 = vmax.f32 %v969_v10, %v2766_v48  ;;  %v974_v27 = vld [vmem:[#allocation2 + $0xc8] sm:$0xff]  ;;  %v977_v38 = vld [vmem:[#allocation2 + $0x70] sm:$0xff]  ;;  %v1008_v52 = vmax.f32 %v976_v31, %v2796_v57  ;;  %s2349_s9 = smov (!%p2119_p5), 6  }
  0xef   : > { %1023 = vst [vmem:[#allocation2 + $0x50] sm:$0xff] %v991_v60  ;;  %v1002_v41 = vmax.f32 %v970_v12, %v2772_v51  ;;  %v973_v60 = vld [vmem:[#allocation2 + $0x40] sm:$0xff]  ;;  %v1006_v48 = vmax.f32 %v974_v27, %v2788_v55  ;;  %v1007_v51 = vmax.f32 %v975_v9, %v2792_v56  ;;  %v979_v17 = vld [vmem:[#allocation2 + $0xa8] sm:$0xff]  ;;  %v981_v23 = vld [vmem:[#allocation2 + $0x10] sm:$0xff] }
  0xf0   : > { %1024 = vst [vmem:[#allocation2 + $0x68] sm:$0xff] %v992_v14  ;;  %v972_v14 = vld [vmem:[#allocation2 + $0x58] sm:$0xff]  ;;  %v1005_v47 = vmax.f32 %v973_v60, %v2784_v54  ;;  %v978_v39 = vld [vmem:[#allocation2 + $0xc0] sm:$0xff]  ;;  %v1011_v55 = vmax.f32 %v979_v17, %v2813_v62  ;;  %v1013_v57 = vmax.f32 %v981_v23, %v2821_v0  ;;  %v1053_v13 = vld [vmem:[#allocation3 + $0xe8] sm:$0xff] }
  0xf1   : > { %1025 = vst [vmem:[#allocation2 + $0x30] sm:$0xff] %v993_v22  ;;  %v1004_v46 = vmax.f32 %v972_v14, %v2780_v53  ;;  %v1009_v53 = vmax.f32 %v977_v38, %v2800_v58  ;;  %v980_v22 = vld [vmem:[#allocation2 + $0xd0] sm:$0xff]  ;;  %v1010_v54 = vmax.f32 %v978_v39, %v2809_v61  ;;  %v983_v1 = vld [vmem:[#allocation2 + $0xa0] sm:$0xff]  ;;  %v1055_v10 = vld [vmem:[#allocation3 + $0x8] sm:$0xff] }
  0xf2   : > { %1026 = vst [vmem:[#allocation2 + $0x48] sm:$0xff] %v994_v24  ;;  %v982_v24 = vld [vmem:[#allocation2 + $0x28] sm:$0xff]  ;;  %v1012_v56 = vmax.f32 %v980_v22, %v2817_v63  ;;  %v985_v26 = vld [vmem:[#allocation2 + $0x20] sm:$0xff]  ;;  %v1015_v61 = vmax.f32 %v983_v1, %v2831_v5  ;;  %v1057_v12 = vld [vmem:[#allocation3 + $0x58] sm:$0xff] }
  0xf3   : > { %1027 = vst [vmem:[#allocation2 + $0x80] sm:$0xff] %v995_v28  ;;  %v984_v28 = vld [vmem:[#allocation2 + $0xf8] sm:$0xff]  ;;  %v1014_v58 = vmax.f32 %v982_v24, %v2827_v4  ;;  %v1051_v19 = vld [vmem:[#allocation3 + $0x80] sm:$0xff]  ;;  %v1017_v63 = vmax.f32 %v985_v26, %v2839_v7  ;;  %v1059_v59 = vld [vmem:[#allocation3 + $0xd0] sm:$0xff] }
  0xf4   : > { %1028 = vst [vmem:[#allocation2 + $0x88] sm:$0xff] %v996_v29  ;;  %v986_v29 = vld [vmem:[#allocation2 + $0x98] sm:$0xff]  ;;  %v1016_v62 = vmax.f32 %v984_v28, %v2835_v6  ;;  %v1083_v4 = vmax.f32 %v1051_v19, %v2852_v15  ;;  %v1085_v6 = vmax.f32 %v1053_v13, %v2863_v20  ;;  %v1063_v60 = vld [vmem:[#allocation3 + $0xe0] sm:$0xff]  ;;  %v1067_v9 = vld [vmem:[#allocation3 + $0x10] sm:$0xff] }
  0xf5   : > { %1029 = vst [vmem:[#allocation2 + $0xe8] sm:$0xff] %v997_v30  ;;  %v1052_v30 = vld [vmem:[#allocation3 + $0xc8] sm:$0xff]  ;;  %v1018_v0 = vmax.f32 %v986_v29, %v2845_v11  ;;  %v1087_v11 = vmax.f32 %v1055_v10, %v2871_v25  ;;  %v1061_v14 = vld [vmem:[#allocation3 + $0x38] sm:$0xff]  ;;  %v1068_v31 = vld [vmem:[#allocation3 + $0x70] sm:$0xff] }
  0xf6   : > { %1030 = vst [vmem:[#allocation2 + $0xb8] sm:$0xff] %v998_v34  ;;  %v1054_v34 = vld [vmem:[#allocation3 + $0x78] sm:$0xff]  ;;  %v1084_v5 = vmax.f32 %v1052_v30, %v2856_v16  ;;  %v1089_v16 = vmax.f32 %v1057_v12, %v2882_v33  ;;  %v1069_v38 = vld [vmem:[#allocation3 + $0x50] sm:$0xff]  ;;  %v1070_v39 = vld [vmem:[#allocation3 + $0xa0] sm:$0xff] }
  0xf7   : > { %1031 = vst [vmem:[#allocation2 + $0x60] sm:$0xff] %v999_v35  ;;  %v1056_v35 = vld [vmem:[#allocation3 + $0x90] sm:$0xff]  ;;  %v1086_v7 = vmax.f32 %v1054_v34, %v2867_v21  ;;  %v1091_v21 = vmax.f32 %v1059_v59, %v2893_v44  ;;  %v1065_v27 = vld [vmem:[#allocation3 + $0x18] sm:$0xff]  ;;  %v3790_v10 = vld [vmem:[#allocation25_spill] sm:$0xff] }
  0xf8   : > { %1032 = vst [vmem:[#allocation2 + $0xf0] sm:$0xff] %v1000_v36  ;;  %v1058_v36 = vld [vmem:[#allocation3 + $0xa8] sm:$0xff]  ;;  %v1088_v15 = vmax.f32 %v1056_v35, %v2878_v32  ;;  %v1093_v32 = vmax.f32 %v1061_v14, %v2901_v49  ;;  %v1071_v17 = vld [vmem:[#allocation3 + $0xd8] sm:$0xff]  ;;  %v1072_v22 = vld [vmem:[#allocation3 + $0x30] sm:$0xff] }
  0xf9   : > { %1033 = vst [vmem:[#allocation2 + $0x8] sm:$0xff] %v1001_v40  ;;  %v1060_v40 = vld [vmem:[#allocation3 + $0xb0] sm:$0xff]  ;;  %v1090_v20 = vmax.f32 %v1058_v36, %v2886_v37  ;;  %v1095_v37 = vmax.f32 %v1063_v60, %v2912_v3  ;;  %v1103_v24 = vmax.f32 %v1071_v17, %v2953_v18  ;;  %v1104_v1 = vmax.f32 %v1072_v22, %v2957_v43  ;;  %v3785_v26 = vld [vmem:[#allocation20_spill] sm:$0xff] }
  0xfa   : > { %1034 = vst [vmem:[#allocation2 + $0x78] sm:$0xff] %v1002_v41  ;;  %v1062_v41 = vld [vmem:[#allocation3 + $0x40] sm:$0xff]  ;;  %v1092_v25 = vmax.f32 %v1060_v40, %v2897_v45  ;;  %v1077_v29 = vld [vmem:[#allocation3 + $0xf8] sm:$0xff]  ;;  %v3787_v30 = vld [vmem:[#allocation22_spill] sm:$0xff] }
  0xfb   : > { %1035 = vst [vmem:[#allocation2 + $0x38] sm:$0xff] %v1003_v42  ;;  %v1064_v42 = vld [vmem:[#allocation3 + $0x60] sm:$0xff]  ;;  %v1094_v33 = vmax.f32 %v1062_v41, %v2908_v2  ;;  %v3788_v13 = vld [vmem:[#allocation23_spill] sm:$0xff] }
  0xfc   : > { %1036 = vst [vmem:[#allocation2 + $0x58] sm:$0xff] %v1004_v46  ;;  %v1066_v46 = vld [vmem:[#allocation3 + $0x68] sm:$0xff]  ;;  %v1096_v44 = vmax.f32 %v1064_v42, %v2916_v8  ;;  %v1109_v43 = vmax.f32 %v1077_v29, %v3788_v13  ;;  %v3789_v34 = vld [vmem:[#allocation24_spill] sm:$0xff] }
  0xfd   : > { %1037 = vst [vmem:[#allocation2 + $0x40] sm:$0xff] %v1005_v47  ;;  %v3779_v47 = vld [vmem:[#allocation14_spill] sm:$0xff]  ;;  %v1082_v35 = vld [vmem:[#allocation3 + $0x98] sm:$0xff] }
  0xfe   : > { %1038 = vst [vmem:[#allocation2 + $0xc8] sm:$0xff] %v1006_v48  ;;  %v1097_v45 = vmax.f32 %v1065_v27, %v3779_v47  ;;  %v3780_v48 = vld [vmem:[#allocation15_spill] sm:$0xff] }
  0xff   : > { %1039 = vst [vmem:[#allocation2 + $0xe0] sm:$0xff] %v1007_v51  ;;  %v1098_v49 = vmax.f32 %v1066_v46, %v3780_v48  ;;  %v3781_v51 = vld [vmem:[#allocation16_spill] sm:$0xff] }
 0x100   : > { %1040 = vst [vmem:[#allocation2 + $0x90] sm:$0xff] %v1008_v52  ;;  %v1099_v2 = vmax.f32 %v1067_v9, %v3781_v51  ;;  %v3782_v52 = vld [vmem:[#allocation17_spill] sm:$0xff] }
 0x101   : > { %1041 = vst [vmem:[#allocation2 + $0x70] sm:$0xff] %v1009_v53  ;;  %v1100_v3 = vmax.f32 %v1068_v31, %v3782_v52  ;;  %v3783_v53 = vld [vmem:[#allocation18_spill] sm:$0xff] }
 0x102   : > { %1042 = vst [vmem:[#allocation2 + $0xc0] sm:$0xff] %v1010_v54  ;;  %v1101_v8 = vmax.f32 %v1069_v38, %v3783_v53  ;;  %v3784_v54 = vld [vmem:[#allocation19_spill] sm:$0xff] }
 0x103   : > { %1043 = vst [vmem:[#allocation2 + $0xa8] sm:$0xff] %v1011_v55  ;;  %v1102_v23 = vmax.f32 %v1070_v39, %v3784_v54  ;;  %v1073_v55 = vld [vmem:[#allocation3 + $0x20] sm:$0xff] }
 0x104   : > { %1044 = vst [vmem:[#allocation2 + $0xd0] sm:$0xff] %v1012_v56  ;;  %v1074_v56 = vld [vmem:[#allocation3 + $0xf0] sm:$0xff]  ;;  %v1105_v28 = vmax.f32 %v1073_v55, %v2961_v50 }
 0x105   : > { %1045 = vst [vmem:[#allocation2 + $0x10] sm:$0xff] %v1013_v57  ;;  %v1075_v57 = vld [vmem:[#allocation3 + $0x88] sm:$0xff] }
 0x106   : > { %1046 = vst [vmem:[#allocation2 + $0x28] sm:$0xff] %v1014_v58  ;;  %v1076_v58 = vld [vmem:[#allocation3 + $0x48] sm:$0xff] }
 0x107   : > { %1047 = vst [vmem:[#allocation2 + $0xa0] sm:$0xff] %v1015_v61  ;;  %v1106_v61 = vmax.f32 %v1074_v56, %v3785_v26  ;;  %v1108_v18 = vmax.f32 %v1076_v58, %v3787_v30 }
 0x108   : > { %1048 = vst [vmem:[#allocation2 + $0xf8] sm:$0xff] %v1016_v62  ;;  %v3786_v62 = vld [vmem:[#allocation21_spill] sm:$0xff] }
 0x109   : > { %1049 = vst [vmem:[#allocation2 + $0x20] sm:$0xff] %v1017_v63  ;;  %v1107_v19 = vmax.f32 %v1075_v57, %v3786_v62  ;;  %v1078_v63 = vld [vmem:[#allocation3 + $0xc0] sm:$0xff] }
 0x10a   : > { %1050 = vst [vmem:[#allocation2 + $0x98] sm:$0xff] %v1018_v0  ;;  %v1079_v0 = vld [vmem:[#allocation3 + $0xb8] sm:$0xff]  ;;  %v1110_v50 = vmax.f32 %v1078_v63, %v3789_v34 }
 0x10b   : > { %1115 = vst [vmem:[#allocation3 + $0x80] sm:$0xff] %v1083_v4  ;;  %v1080_v4 = vld [vmem:[#allocation3] sm:$0xff] }
 0x10c   : > { %1116 = vst [vmem:[#allocation3 + $0xc8] sm:$0xff] %v1084_v5  ;;  %v1081_v5 = vld [vmem:[#allocation3 + $0x28] sm:$0xff] }
 0x10d   : > { %1117 = vst [vmem:[#allocation3 + $0xe8] sm:$0xff] %v1085_v6  ;;  %v1111_v6 = vmax.f32 %v1079_v0, %v3790_v10 }
 0x10e   : > { %1118 = vst [vmem:[#allocation3 + $0x78] sm:$0xff] %v1086_v7  ;;  %v3791_v7 = vld [vmem:[#allocation26_spill] sm:$0xff] }
 0x10f   : > { %1119 = vst [vmem:[#allocation3 + $0x8] sm:$0xff] %v1087_v11  ;;  %v1112_v12 = vmax.f32 %v1080_v4, %v3791_v7  ;;  %v3792_v11 = vld [vmem:[#allocation27_spill] sm:$0xff] }
 0x110   : > { %1120 = vst [vmem:[#allocation3 + $0x90] sm:$0xff] %v1088_v15  ;;  %v1113_v36 = vmax.f32 %v1081_v5, %v3792_v11  ;;  %v3793_v15 = vld [vmem:[#allocation28_spill] sm:$0xff] }
 0x111   : > { %1121 = vst [vmem:[#allocation3 + $0x58] sm:$0xff] %v1089_v16  ;;  %v1114_v59 = vmax.f32 %v1082_v35, %v3793_v15 }
 0x112   : > { %1122 = vst [vmem:[#allocation3 + $0xa8] sm:$0xff] %v1090_v20 }
 0x113   : > { %1123 = vst [vmem:[#allocation3 + $0xd0] sm:$0xff] %v1091_v21 }
 0x114   : > { %1124 = vst [vmem:[#allocation3 + $0xb0] sm:$0xff] %v1092_v25 }
 0x115   : > { %1125 = vst [vmem:[#allocation3 + $0x38] sm:$0xff] %v1093_v32 }
 0x116   : > { %1126 = vst [vmem:[#allocation3 + $0x40] sm:$0xff] %v1094_v33 }
 0x117   : > { %1127 = vst [vmem:[#allocation3 + $0xe0] sm:$0xff] %v1095_v37 }
 0x118   : > { %1128 = vst [vmem:[#allocation3 + $0x60] sm:$0xff] %v1096_v44 }
 0x119   : > { %1129 = vst [vmem:[#allocation3 + $0x18] sm:$0xff] %v1097_v45 }
 0x11a   : > { %1130 = vst [vmem:[#allocation3 + $0x68] sm:$0xff] %v1098_v49 }
 0x11b   : > { %1131 = vst [vmem:[#allocation3 + $0x10] sm:$0xff] %v1099_v2 }
 0x11c   : > { %1132 = vst [vmem:[#allocation3 + $0x70] sm:$0xff] %v1100_v3 }
 0x11d   : > { %1133 = vst [vmem:[#allocation3 + $0x50] sm:$0xff] %v1101_v8 }
 0x11e   : > { %1134 = vst [vmem:[#allocation3 + $0xa0] sm:$0xff] %v1102_v23 }
 0x11f   : > { %1135 = vst [vmem:[#allocation3 + $0xd8] sm:$0xff] %v1103_v24 }
 0x120   : > { %1136 = vst [vmem:[#allocation3 + $0x30] sm:$0xff] %v1104_v1 }
 0x121   : > { %1137 = vst [vmem:[#allocation3 + $0x20] sm:$0xff] %v1105_v28 }
 0x122   : > { %1138 = vst [vmem:[#allocation3 + $0xf0] sm:$0xff] %v1106_v61 }
 0x123   : > { %1139 = vst [vmem:[#allocation3 + $0x88] sm:$0xff] %v1107_v19 }
 0x124   : > { %1140 = vst [vmem:[#allocation3 + $0x48] sm:$0xff] %v1108_v18 }
 0x125   : > { %1141 = vst [vmem:[#allocation3 + $0xf8] sm:$0xff] %v1109_v43 }
 0x126   : > { %1142 = vst [vmem:[#allocation3 + $0xc0] sm:$0xff] %v1110_v50  ;;  %1150 = sbr.rel (%p2119_p5) target bundleno = 1643 (0x66b), region = 144 }
 0x127   : > { %1143 = vst [vmem:[#allocation3 + $0xb8] sm:$0xff] %v1111_v6 }
 0x128   : > { %1144 = vst [vmem:[#allocation3] sm:$0xff] %v1112_v12 }
 0x129   : > { %1145 = vst [vmem:[#allocation3 + $0x28] sm:$0xff] %v1113_v36 }
 0x12a   : > { %1146 = vst [vmem:[#allocation3 + $0x98] sm:$0xff] %v1114_v59 }
 0x12b   : > { %v1249_v16 = vld [vmem:[#allocation3 + $0xe8] sm:$0xff]  ;;  %v1247_v40 = vld [vmem:[#allocation3 + $0x80] sm:$0xff]  ;;  %v1151_v21 = vld [vmem:[#allocation2 + $0xb0] sm:$0xff]  ;;  %vm1378_vm1 = vcmask 130112   ;;  %vm1382_vm2 = vcmask 195712   ;;  %vm1386_vm3 = vcmask 261312  }
 0x12c   : > { %v1152_v20 = vld [vmem:[#allocation2] sm:$0xff]  ;;  %1283 = vmax.xlane.f32.xlu1 %v1249_v16  ;;  %1279 = vmax.xlane.f32.xlu0 %v1247_v40  ;;  %v1248_v14 = vld [vmem:[#allocation3 + $0xc8] sm:$0xff]  ;;  %v1250_v41 = vld [vmem:[#allocation3 + $0x78] sm:$0xff]  ;;  %vm1390_vm4 = vcmask 326912   ;;  %vm1394_vm5 = vcmask 392512   ;;  %vm1398_vm6 = vcmask 458112  }
 0x12d   : > { %1185 = vmax.xlane.f32.xlu2 %v1152_v20  ;;  %v1263_v25 = vld [vmem:[#allocation3 + $0x10] sm:$0xff]  ;;  %v1153_v32 = vld [vmem:[#allocation2 + $0xd8] sm:$0xff]  ;;  %v1251_v42 = vld [vmem:[#allocation3 + $0x8] sm:$0xff]  ;;  %vm1402_vm7 = vcmask 523712   ;;  %vm1406_vm8 = vcmask 589312   ;;  %vm1410_vm9 = vcmask 654912  }
 0x12e   : > { %v1264_v60 = vld [vmem:[#allocation3 + $0x70] sm:$0xff]  ;;  %v1154_v27 = vld [vmem:[#allocation2 + $0x18] sm:$0xff]  ;;  %v1266_v9 = vld [vmem:[#allocation3 + $0xa0] sm:$0xff]  ;;  %vm1414_vm10 = vcmask 720512   ;;  %vm1418_vm11 = vcmask 786112   ;;  %vm1422_vm12 = vcmask 851712  }
 0x12f   : > { %v1265_v33 = vld [vmem:[#allocation3 + $0x50] sm:$0xff]  ;;  %v1167_v37 = vld [vmem:[#allocation2 + $0x38] sm:$0xff]  ;;  %v1169_v45 = vld [vmem:[#allocation2 + $0x40] sm:$0xff]  ;;  %vm1426_vm13 = vcmask 917312   ;;  %vm1430_vm14 = vcmask 982912   ;;  %vm1434_vm15 = vcmask 1048512  }
 0x130   : > { %v1168_v46 = vld [vmem:[#allocation2 + $0x58] sm:$0xff]  ;;  %v1252_v44 = vld [vmem:[#allocation3 + $0x90] sm:$0xff]  ;;  %v1156_v49 = vld [vmem:[#allocation2 + $0x68] sm:$0xff]  ;;  %vm1758_vm0 = vcmask 523264  }
 0x131   : > { %v1155_v47 = vld [vmem:[#allocation2 + $0x50] sm:$0xff]  ;;  %v1253_v31 = vld [vmem:[#allocation3 + $0x58] sm:$0xff]  ;;  %v1170_v38 = vld [vmem:[#allocation2 + $0xc8] sm:$0xff] }
 0x132   : > { %v1267_v48 = vld [vmem:[#allocation3 + $0xd8] sm:$0xff]  ;;  %v1254_v51 = vld [vmem:[#allocation3 + $0xa8] sm:$0xff]  ;;  %v1268_v2 = vld [vmem:[#allocation3 + $0x30] sm:$0xff] }
 0x133   : > { %v1157_v39 = vld [vmem:[#allocation2 + $0x30] sm:$0xff]  ;;  %v1171_v52 = vld [vmem:[#allocation2 + $0xe0] sm:$0xff]  ;;  %v1158_v53 = vld [vmem:[#allocation2 + $0x48] sm:$0xff] }
 0x134   : > { %1281 = vmax.xlane.f32.xlu0 %v1248_v14  ;;  %1183 = vmax.xlane.f32.xlu1 %v1151_v21  ;;  %v1255_v3 = vld [vmem:[#allocation3 + $0xd0] sm:$0xff]  ;;  %v1269_v17 = vld [vmem:[#allocation3 + $0x20] sm:$0xff]  ;;  %v1257_v24 = vld [vmem:[#allocation3 + $0x38] sm:$0xff] }
 0x135   : > { %1285 = vmax.xlane.f32.xlu2 %v1250_v41  ;;  %v1172_v8 = vld [vmem:[#allocation2 + $0x90] sm:$0xff]  ;;  %v1159_v23 = vld [vmem:[#allocation2 + $0x80] sm:$0xff]  ;;  %v1271_v56 = vld [vmem:[#allocation3 + $0x88] sm:$0xff] }
 0x136   : > { %v1256_v22 = vld [vmem:[#allocation3 + $0xb0] sm:$0xff]  ;;  %v1160_v1 = vld [vmem:[#allocation2 + $0x88] sm:$0xff]  ;;  %v1174_v57 = vld [vmem:[#allocation2 + $0xc0] sm:$0xff] }
 0x137   : > { %v1270_v54 = vld [vmem:[#allocation3 + $0xf0] sm:$0xff]  ;;  %v1258_v28 = vld [vmem:[#allocation3 + $0x40] sm:$0xff]  ;;  %v1272_v58 = vld [vmem:[#allocation3 + $0x48] sm:$0xff] }
 0x138   : > { %v1173_v55 = vld [vmem:[#allocation2 + $0x70] sm:$0xff]  ;;  %v1161_v26 = vld [vmem:[#allocation2 + $0xe8] sm:$0xff]  ;;  %v1259_v29 = vld [vmem:[#allocation3 + $0xe0] sm:$0xff] }
 0x139   : > { %v1175_v61 = vld [vmem:[#allocation2 + $0xa8] sm:$0xff]  ;;  %v1273_v62 = vld [vmem:[#allocation3 + $0xf8] sm:$0xff]  ;;  %v1176_v0 = vld [vmem:[#allocation2 + $0xd0] sm:$0xff] }
 0x13a   : > { %v1162_v19 = vld [vmem:[#allocation2 + $0xb8] sm:$0xff]  ;;  %v1260_v13 = vld [vmem:[#allocation3 + $0x60] sm:$0xff]  ;;  %v1177_v40 = vld [vmem:[#allocation2 + $0x10] sm:$0xff] }
 0x13b   : > { %v3794_v43 = vld [vmem:[#allocation13_spill] sm:$0xff]  ;;  %v1261_v21 = vld [vmem:[#allocation3 + $0x18] sm:$0xff] }
 0x13c   : > { %1311 = vmax.xlane.f32.xlu0 %v1263_v25  ;;  %1313 = vmax.xlane.f32.xlu1 %v1264_v60  ;;  %v3136_v4 = vadd.s32 4294967288, %v3794_v43  ;;  %v1274_v34 = vld [vmem:[#allocation3 + $0xc0] sm:$0xff]  ;;  %v3139_v50 = vadd.s32 4294967280, %v3794_v43  ;;  %v3142_v5 = vadd.s32 4294967272, %v3794_v43 }
 0x13d   : > { %1187 = vmax.xlane.f32.xlu2 %v1153_v32  ;;  %v1163_v16 = vld [vmem:[#allocation2 + $0x60] sm:$0xff] }
 0x144   : > { %1287 = vmax.xlane.f32.xlu0 %v1251_v42  ;;  %1315 = vmax.xlane.f32.xlu1 %v1265_v33 }
 0x145   : > { %1189 = vmax.xlane.f32.xlu2 %v1154_v27 }
 0x14c   : > { %1215 = vmax.xlane.f32.xlu0 %v1167_v37  ;;  %1217 = vmax.xlane.f32.xlu1 %v1168_v46  ;;  %v1275_v46 = vld [vmem:[#allocation3 + $0xb8] sm:$0xff] }
 0x14d   : > { %1289 = vmax.xlane.f32.xlu2 %v1252_v44  ;;  %v1164_v44 = vld [vmem:[#allocation2 + $0xf0] sm:$0xff] }
 0x154   : > { %1317 = vmax.xlane.f32.xlu0 %v1266_v9  ;;  %1191 = vmax.xlane.f32.xlu1 %v1155_v47  ;;  %v1178_v47 = vld [vmem:[#allocation2 + $0x28] sm:$0xff] }
 0x155   : > { %1219 = vmax.xlane.f32.xlu2 %v1169_v45 }
 0x15c   : > { %1291 = vmax.xlane.f32.xlu0 %v1253_v31  ;;  %1319 = vmax.xlane.f32.xlu1 %v1267_v48  ;;  %v3160_v31 = vadd.s32 4294967264, %v3794_v43 }
 0x15d   : > { %1193 = vmax.xlane.f32.xlu2 %v1156_v49 }
 0x164   : > { %1221 = vmax.xlane.f32.xlu0 %v1170_v38  ;;  %1293 = vmax.xlane.f32.xlu1 %v1254_v51 }
 0x165   : > { %1321 = vmax.xlane.f32.xlu2 %v1268_v2 }
 0x16c   : > { %1195 = vmax.xlane.f32.xlu0 %v1157_v39  ;;  %1223 = vmax.xlane.f32.xlu1 %v1171_v52  ;;  %v1262_v52 = vld [vmem:[#allocation3 + $0x68] sm:$0xff] }
 0x16d   : > { %1295 = vmax.xlane.f32.xlu2 %v1255_v3  ;;  %v1276_v3 = vld [vmem:[#allocation3] sm:$0xff] }
 0x174   : > { %1323 = vmax.xlane.f32.xlu0 %v1269_v17  ;;  %1197 = vmax.xlane.f32.xlu1 %v1158_v53 }
 0x175   : > { %1225 = vmax.xlane.f32.xlu2 %v1172_v8  ;;  %v1165_v8 = vld [vmem:[#allocation2 + $0x8] sm:$0xff] }
 0x17c   : > { %1297 = vmax.xlane.f32.xlu0 %v1256_v22  ;;  %1325 = vmax.xlane.f32.xlu1 %v1270_v54  ;;  %v3169_v54 = vadd.s32 4294967256, %v3794_v43 }
 0x17d   : > { %1199 = vmax.xlane.f32.xlu2 %v1159_v23 }
 0x184   : > { %1227 = vmax.xlane.f32.xlu0 %v1173_v55  ;;  %1299 = vmax.xlane.f32.xlu1 %v1257_v24 }
 0x185   : > { %1327 = vmax.xlane.f32.xlu2 %v1271_v56 }
 0x18c   : > { %1201 = vmax.xlane.f32.xlu0 %v1160_v1  ;;  %1229 = vmax.xlane.f32.xlu1 %v1174_v57 }
 0x18d   : > { %1301 = vmax.xlane.f32.xlu2 %v1258_v28  ;;  %v1179_v28 = vld [vmem:[#allocation2 + $0xa0] sm:$0xff] }
 0x194   : > { %1329 = vmax.xlane.f32.xlu0 %v1272_v58  ;;  %1203 = vmax.xlane.f32.xlu1 %v1161_v26  ;;  %v1277_v58 = vld [vmem:[#allocation3 + $0x28] sm:$0xff] }
 0x195   : > { %1231 = vmax.xlane.f32.xlu2 %v1175_v61  ;;  %v1166_v61 = vld [vmem:[#allocation2 + $0x78] sm:$0xff] }
 0x19c   : > { %1303 = vmax.xlane.f32.xlu0 %v1259_v29  ;;  %1331 = vmax.xlane.f32.xlu1 %v1273_v62 }
 0x19d   : > { %1205 = vmax.xlane.f32.xlu2 %v1162_v19 }
 0x19f   : > { %v1284_v63 = vpop.xlane.xlu1 %1283  ;;  %v1280_v30 = vpop.xlane.xlu0 %1279 }
 0x1a0   : > { %v1186_v18 = vpop.xlane.xlu2 %1185  ;;  %v1501_v7 = vperm.slane %v1280_v30, %v3794_v43  ;;  %v1504_v15 = vperm.slane %v1284_v63, %v3139_v50 }
 0x1a1   : > { %v1377_v10 = vperm.slane %v1186_v18, %v3136_v4 }
 0x1a4   : > { %1233 = vmax.xlane.f32.xlu0 %v1176_v0  ;;  %1305 = vmax.xlane.f32.xlu1 %v1260_v13  ;;  %v1180_v13 = vld [vmem:[#allocation2 + $0xf8] sm:$0xff] }
 0x1a5   : > { %1333 = vmax.xlane.f32.xlu2 %v1274_v34 }
 0x1a7   : > { %v1282_v6 = vpop.xlane.xlu0 %1281  ;;  %v1184_v35 = vpop.xlane.xlu1 %1183 }
 0x1a8   : > { %v1502_v12 = vperm.slane %v1282_v6, %v3136_v4  ;;  %v1286_v11 = vpop.xlane.xlu2 %1285  ;;  %v1375_v36 = vperm.slane %v1184_v35, %v3794_v43  ;;  %v1181_v6 = vld [vmem:[#allocation2 + $0x20] sm:$0xff] }
 0x1a9   : > { %v1506_v59 = vperm.slane %v1286_v11, %v3142_v5 }
 0x1aa   : > { %v1503_v20 = vsel %vm1378_vm1, %v1502_v12, %v1501_v7  ;;  %v1379_v14 = vsel %vm1378_vm1, %v1377_v10, %v1375_v36  ;;  %v3183_v7 = vadd.s32 4294967248, %v3794_v43 }
 0x1ab   : > { %v1505_v41 = vsel %vm1382_vm2, %v1504_v15, %v1503_v20 }
 0x1ac   : > { %v1507_v25 = vsel %vm1386_vm3, %v1506_v59, %v1505_v41  ;;  %1207 = vmax.xlane.f32.xlu0 %v1163_v16  ;;  %1235 = vmax.xlane.f32.xlu1 %v1177_v40  ;;  %v1182_v16 = vld [vmem:[#allocation2 + $0x98] sm:$0xff] }
 0x1ad   : > { %1307 = vmax.xlane.f32.xlu2 %v1261_v21  ;;  %v3192_v21 = vadd.s32 4294967240, %v3794_v43 }
 0x1af   : > { %v1312_v60 = vpop.xlane.xlu0 %1311  ;;  %v1314_v32 = vpop.xlane.xlu1 %1313 }
 0x1b0   : > { %v1532_v42 = vperm.slane %v1312_v60, %v3794_v43  ;;  %v1188_v33 = vpop.xlane.xlu2 %1187  ;;  %v1533_v27 = vperm.slane %v1314_v32, %v3136_v4 }
 0x1b1   : > { %v1381_v37 = vperm.slane %v1188_v33, %v3139_v50 }
 0x1b2   : > { %v1534_v9 = vsel %vm1378_vm1, %v1533_v27, %v1532_v42 }
 0x1b3   : > { %v1383_v45 = vsel %vm1382_vm2, %v1381_v37, %v1379_v14 }
 0x1b4   : > { %1335 = vmax.xlane.f32.xlu0 %v1275_v46  ;;  %1209 = vmax.xlane.f32.xlu1 %v1164_v44  ;;  %v3201_v44 = vadd.s32 4294967232, %v3794_v43 }
 0x1b5   : > { %1237 = vmax.xlane.f32.xlu2 %v1178_v47 }
 0x1b7   : > { %v1288_v48 = vpop.xlane.xlu0 %1287  ;;  %v1316_v49 = vpop.xlane.xlu1 %1315 }
 0x1b8   : > { %v1508_v38 = vperm.slane %v1288_v48, %v3160_v31  ;;  %v1190_v51 = vpop.xlane.xlu2 %1189  ;;  %v1535_v2 = vperm.slane %v1316_v49, %v3139_v50 }
 0x1b9   : > { %v1385_v39 = vperm.slane %v1190_v51, %v3142_v5 }
 0x1ba   : > { %v1509_v17 = vsel %vm1390_vm4, %v1508_v38, %v1507_v25  ;;  %v1536_v53 = vsel %vm1382_vm2, %v1535_v2, %v1534_v9 }
 0x1bb   : > { %v1387_v22 = vsel %vm1386_vm3, %v1385_v39, %v1383_v45 }
 0x1bc   : > { %1309 = vmax.xlane.f32.xlu0 %v1262_v52  ;;  %1337 = vmax.xlane.f32.xlu1 %v1276_v3 }
 0x1bd   : > { %1211 = vmax.xlane.f32.xlu2 %v1165_v8 }
 0x1bf   : > { %v1216_v23 = vpop.xlane.xlu0 %1215  ;;  %v1218_v55 = vpop.xlane.xlu1 %1217 }
 0x1c0   : > { %v1436_v24 = vperm.slane %v1216_v23, %v3794_v43  ;;  %v1290_v56 = vpop.xlane.xlu2 %1289  ;;  %v1437_v1 = vperm.slane %v1218_v55, %v3136_v4  ;;  %v1278_v4 = vld [vmem:[#allocation3 + $0x98] sm:$0xff] }
 0x1c1   : > { %v1510_v57 = vperm.slane %v1290_v56, %v3169_v54 }
 0x1c2   : > { %v1438_v26 = vsel %vm1378_vm1, %v1437_v1, %v1436_v24  ;;  %vm1788_vm1 = vcmask 261120  }
 0x1c3   : > { %v1511_v29 = vsel %vm1394_vm5, %v1510_v57, %v1509_v17 }
 0x1c4   : > { %1239 = vmax.xlane.f32.xlu0 %v1179_v28  ;;  %1339 = vmax.xlane.f32.xlu1 %v1277_v58 }
 0x1c5   : > { %1213 = vmax.xlane.f32.xlu2 %v1166_v61 }
 0x1c7   : > { %v1318_v62 = vpop.xlane.xlu0 %1317  ;;  %v1192_v19 = vpop.xlane.xlu1 %1191 }
 0x1c8   : > { %v1537_v63 = vperm.slane %v1318_v62, %v3142_v5  ;;  %v1220_v30 = vpop.xlane.xlu2 %1219  ;;  %v1389_v18 = vperm.slane %v1192_v19, %v3160_v31 }
 0x1c9   : > { %v1439_v0 = vperm.slane %v1220_v30, %v3139_v50 }
 0x1ca   : > { %v1538_v34 = vsel %vm1386_vm3, %v1537_v63, %v1536_v53  ;;  %v1391_v10 = vsel %vm1390_vm4, %v1389_v18, %v1387_v22  ;;  %v1610_v63 = vld [vmem:[%s3795_s2 + $0x168] sm:$0xff] }
 0x1cb   : > { %v1440_v35 = vsel %vm1382_vm2, %v1439_v0, %v1438_v26  ;;  %v1611_v26 = vld [vmem:[%s3795_s2 + $0x170] sm:$0xff]  ;;  %v1609_v0 = vld [vmem:[%s3795_s2 + $0x160] sm:$0xff]  ;;  %vm1813_vm2 = vcmask 24576  }
 0x1cc   : > { %1241 = vmax.xlane.f32.xlu0 %v1180_v13  ;;  %1341 = vmax.xlane.f32.xlu1 %v1278_v4  ;;  %v1580_v4 = vld [vmem:[%s3795_s2 + $0x78] sm:$0xff] }
 0x1cd   : > { %1243 = vmax.xlane.f32.xlu2 %v1181_v6  ;;  %1630 = vmatpush.msra.mxu0 %v1580_v4  ;;  %v1607_v6 = vld [vmem:[%s3795_s2 + $0x150] sm:$0xff]  ;;  %v1590_v4 = vld [vmem:[%s3795_s2 + $0xc8] sm:$0xff] }
 0x1cf   : > { %v1292_v12 = vpop.xlane.xlu0 %1291  ;;  %v1320_v11 = vpop.xlane.xlu1 %1319 }
 0x1d0   : > { %v1512_v50 = vperm.slane %v1292_v12, %v3183_v7  ;;  %v1194_v36 = vpop.xlane.xlu2 %1193  ;;  %v1539_v15 = vperm.slane %v1320_v11, %v3160_v31 }
 0x1d1   : > { %v1393_v59 = vperm.slane %v1194_v36, %v3169_v54  ;;  %v1606_v36 = vld [vmem:[%s3795_s2 + $0x148] sm:$0xff] }
 0x1d2   : > { %v1513_v40 = vsel %vm1398_vm6, %v1512_v50, %v1511_v29  ;;  %v1540_v20 = vsel %vm1390_vm4, %v1539_v15, %v1538_v34  ;;  %v1608_v34 = vld [vmem:[%s3795_s2 + $0x158] sm:$0xff]  ;;  %v1578_v50 = vld [vmem:[%s3795_s2 + $0x68] sm:$0xff] }
 0x1d3   : > { %v1395_v14 = vsel %vm1394_vm5, %v1393_v59, %v1391_v10  ;;  %v1579_v10 = vld [vmem:[%s3795_s2 + $0x70] sm:$0xff]  ;;  %v1577_v59 = vld [vmem:[%s3795_s2 + $0x60] sm:$0xff] }
 0x1d4   : > { %1245 = vmax.xlane.f32.xlu0 %v1182_v16  ;;  %1631 = vmatpush.msra.mxu0 %v1579_v10  ;;  %v1605_v16 = vld [vmem:[%s3795_s2 + $0x140] sm:$0xff] }
 0x1d5   : > { %v1565_v10 = vld [vmem:[%s3795_s2] sm:$0xff] }
 0x1d6   : > { %1632 = vmatpush.msra.mxu0 %v1578_v50  ;;  %v1616_v50 = vld [vmem:[%s3795_s2 + $0x198] sm:$0xff] }
 0x1d7   : > { %v1222_v41 = vpop.xlane.xlu0 %1221  ;;  %v1294_v25 = vpop.xlane.xlu1 %1293 }
 0x1d8   : > { %v1441_v60 = vperm.slane %v1222_v41, %v3142_v5  ;;  %v1322_v32 = vpop.xlane.xlu2 %1321  ;;  %v1514_v42 = vperm.slane %v1294_v25, %v3192_v21  ;;  %1633 = vmatpush.msra.mxu0 %v1577_v59  ;;  %v1603_v41 = vld [vmem:[%s3795_s2 + $0x130] sm:$0xff] }
 0x1d9   : > { %v1541_v33 = vperm.slane %v1322_v32, %v3169_v54  ;;  %v1627_v25 = vld [vmem:[%s3795_s2 + $0x1f0] sm:$0xff] }
 0x1da   : > { %v1442_v27 = vsel %vm1386_vm3, %v1441_v60, %v1440_v35  ;;  %v1515_v37 = vsel %vm1402_vm7, %v1514_v42, %v1513_v40  ;;  %v1576_v40 = vld [vmem:[%s3795_s2 + $0x58] sm:$0xff]  ;;  %v1615_v59 = vld [vmem:[%s3795_s2 + $0x190] sm:$0xff] }
 0x1db   : > { %v1542_v46 = vsel %vm1394_vm5, %v1541_v33, %v1540_v20  ;;  %v1604_v20 = vld [vmem:[%s3795_s2 + $0x138] sm:$0xff]  ;;  %1634 = vmatpush.msra.mxu0 %v1576_v40  ;;  %v1574_v33 = vld [vmem:[%s3795_s2 + $0x48] sm:$0xff] }
 0x1df   : > { %v1196_v9 = vpop.xlane.xlu0 %1195  ;;  %v1224_v47 = vpop.xlane.xlu1 %1223 }
 0x1e0   : > { %v1397_v45 = vperm.slane %v1196_v9, %v3183_v7  ;;  %v1296_v5 = vpop.xlane.xlu2 %1295  ;;  %v1443_v48 = vperm.slane %v1224_v47, %v3160_v31  ;;  %v1601_v9 = vld [vmem:[%s3795_s2 + $0x120] sm:$0xff] }
 0x1e1   : > { %v1516_v49 = vperm.slane %v1296_v5, %v3201_v44  ;;  %v1625_v47 = vld [vmem:[%s3795_s2 + $0x1e0] sm:$0xff]  ;;  %v1596_v5 = vld [vmem:[%s3795_s2 + $0xf8] sm:$0xff] }
 0x1e2   : > { %v1399_v38 = vsel %vm1398_vm6, %v1397_v45, %v1395_v14  ;;  %v1444_v51 = vsel %vm1390_vm4, %v1443_v48, %v1442_v27  ;;  %v1628_v14 = vld [vmem:[%s3795_s2 + $0x1f8] sm:$0xff]  ;;  %v1602_v27 = vld [vmem:[%s3795_s2 + $0x128] sm:$0xff]  ;;  %1650 = vmatpush.msra.mxu1 %v1596_v5 }
 0x1e3   : > { %v3209_v2 = vsel %vm1406_vm8, %v1516_v49, %v1515_v37  ;;  %1690 = vmatpush.msra.mxu3 %v1628_v14  ;;  %v1626_v37 = vld [vmem:[%s3795_s2 + $0x1e8] sm:$0xff]  ;;  %v1572_v45 = vld [vmem:[%s3795_s2 + $0x38] sm:$0xff] }
 0x1e4   : > { %v1600_v48 = vld [vmem:[%s3795_s2 + $0x118] sm:$0xff]  ;;  %v1586_v14 = vld [vmem:[%s3795_s2 + $0xa8] sm:$0xff] }
 0x1e5   : > { %1691 = vmatpush.msra.mxu3 %v1627_v25  ;;  %v1624_v49 = vld [vmem:[%s3795_s2 + $0x1d8] sm:$0xff]  ;;  %v1613_v25 = vld [vmem:[%s3795_s2 + $0x180] sm:$0xff] }
 0x1e7   : > { %v1324_v39 = vpop.xlane.xlu0 %1323  ;;  %v1198_v52 = vpop.xlane.xlu1 %1197  ;;  %1692 = vmatpush.msra.mxu3 %v1626_v37  ;;  %v1583_v37 = vld [vmem:[%s3795_s2 + $0x90] sm:$0xff] }
 0x1e8   : > { %v1543_v3 = vperm.slane %v1324_v39, %v3183_v7  ;;  %v1226_v17 = vpop.xlane.xlu2 %1225  ;;  %v1401_v53 = vperm.slane %v1198_v52, %v3192_v21  ;;  %v1599_v39 = vld [vmem:[%s3795_s2 + $0x110] sm:$0xff] }
 0x1e9   : > { %v1445_v8 = vperm.slane %v1226_v17, %v3169_v54  ;;  %v1612_v54 = vld [vmem:[%s3795_s2 + $0x178] sm:$0xff]  ;;  %1693 = vmatpush.msra.mxu3 %v1625_v47  ;;  %v1623_v52 = vld [vmem:[%s3795_s2 + $0x1d0] sm:$0xff]  ;;  %v3459_v47 = vadd.s32 4294967200, %v3794_v43 }
 0x1ea   : > { %v1544_v31 = vsel %vm1398_vm6, %v1543_v3, %v1542_v46  ;;  %v1403_v22 = vsel %vm1402_vm7, %v1401_v53, %v1399_v38  ;;  %1670 = vmatpush.msra.mxu2 %v1612_v54  ;;  %v1573_v46 = vld [vmem:[%s3795_s2 + $0x40] sm:$0xff]  ;;  %v1571_v38 = vld [vmem:[%s3795_s2 + $0x30] sm:$0xff]  ;;  %v1592_v54 = vld [vmem:[%s3795_s2 + $0xd8] sm:$0xff] }
 0x1eb   : > { %v1446_v23 = vsel %vm1394_vm5, %v1445_v8, %v1444_v51  ;;  %v1595_v51 = vld [vmem:[%s3795_s2 + $0xf0] sm:$0xff]  ;;  %1694 = vmatpush.msra.mxu3 %v1624_v49  ;;  %v1570_v8 = vld [vmem:[%s3795_s2 + $0x28] sm:$0xff]  ;;  %v3466_v49 = vadd.s32 4294967192, %v3794_v43 }
 0x1ec   : > { %1671 = vmatpush.msra.mxu2 %v1611_v26  ;;  %1651 = vmatpush.msra.mxu1 %v1595_v51  ;;  %v1620_v26 = vld [vmem:[%s3795_s2 + $0x1b8] sm:$0xff]  ;;  %v1582_v51 = vld [vmem:[%s3795_s2 + $0x88] sm:$0xff] }
 0x1ed   : > { %1695 = vmatpush.msra.mxu3 %v1623_v52 }
 0x1ee   : > { %1672 = vmatpush.msra.mxu2 %v1610_v63 }
 0x1ef   : > { %v3217_v55 = vpop.xlane.xlu0 %1297  ;;  %v1326_v24 = vpop.xlane.xlu1 %1325 }
 0x1f0   : > { %v1200_v56 = vpop.xlane.xlu2 %1199  ;;  %v1545_v1 = vperm.slane %v1326_v24, %v3192_v21  ;;  %1673 = vmatpush.msra.mxu2 %v1609_v0  ;;  %v1569_v24 = vld [vmem:[%s3795_s2 + $0x20] sm:$0xff]  ;;  %v1566_v0 = vld [vmem:[%s3795_s2 + $0x8] sm:$0xff] }
 0x1f1   : > { %v1405_v57 = vperm.slane %v1200_v56, %v3201_v44  ;;  %v1593_v56 = vld [vmem:[%s3795_s2 + $0xe0] sm:$0xff] }
 0x1f2   : > { %v1546_v28 = vsel %vm1402_vm7, %v1545_v1, %v1544_v31  ;;  %1674 = vmatpush.msra.mxu2 %v1608_v34  ;;  %v1594_v31 = vld [vmem:[%s3795_s2 + $0xe8] sm:$0xff]  ;;  %v1597_v1 = vld [vmem:[%s3795_s2 + $0x100] sm:$0xff] }
 0x1f3   : > { %v3223_v58 = vsel %vm1406_vm8, %v1405_v57, %v1403_v22  ;;  %v1598_v22 = vld [vmem:[%s3795_s2 + $0x108] sm:$0xff]  ;;  %1652 = vmatpush.msra.mxu1 %v1594_v31  ;;  %v1621_v57 = vld [vmem:[%s3795_s2 + $0x1c0] sm:$0xff] }
 0x1f4   : > { %1675 = vmatpush.msra.mxu2 %v1607_v6  ;;  %v1618_v34 = vld [vmem:[%s3795_s2 + $0x1a8] sm:$0xff]  ;;  %v1589_v6 = vld [vmem:[%s3795_s2 + $0xc0] sm:$0xff] }
 0x1f5   : > { %1653 = vmatpush.msra.mxu1 %v1593_v56 }
 0x1f6   : > { %1676 = vmatpush.msra.mxu2 %v1606_v36  ;;  %v1587_v36 = vld [vmem:[%s3795_s2 + $0xb0] sm:$0xff] }
 0x1f7   : > { %v1228_v61 = vpop.xlane.xlu0 %1227  ;;  %v3231_v29 = vpop.xlane.xlu1 %1299  ;;  %1654 = vmatpush.msra.mxu1 %v1592_v54 }
 0x1f8   : > { %v1447_v62 = vperm.slane %v1228_v61, %v3183_v7  ;;  %v1328_v19 = vpop.xlane.xlu2 %1327  ;;  %1677 = vmatpush.msra.mxu2 %v1605_v16  ;;  %v1567_v61 = vld [vmem:[%s3795_s2 + $0x10] sm:$0xff] }
 0x1f9   : > { %v1547_v30 = vperm.slane %v1328_v19, %v3201_v44  ;;  %v1619_v19 = vld [vmem:[%s3795_s2 + $0x1b0] sm:$0xff] }
 0x1fa   : > { %v1448_v18 = vsel %vm1398_vm6, %v1447_v62, %v1446_v23  ;;  %1678 = vmatpush.msra.mxu2 %v1604_v20  ;;  %v1622_v23 = vld [vmem:[%s3795_s2 + $0x1c8] sm:$0xff]  ;;  %v1591_v62 = vld [vmem:[%s3795_s2 + $0xd0] sm:$0xff] }
 0x1fb   : > { %v3243_v13 = vsel %vm1406_vm8, %v1547_v30, %v1546_v28  ;;  %1696 = vmatpush.msra.mxu3 %v1622_v23  ;;  %v1568_v28 = vld [vmem:[%s3795_s2 + $0x18] sm:$0xff]  ;;  %1655 = vmatpush.msra.mxu1 %v1591_v62 }
 0x1fc   : > { %1679 = vmatpush.msra.mxu2 %v1603_v41  ;;  %v1585_v41 = vld [vmem:[%s3795_s2 + $0xa0] sm:$0xff] }
 0x1fd   : > { %1697 = vmatpush.msra.mxu3 %v1621_v57  ;;  %1656 = vmatpush.msra.mxu1 %v1590_v4 }
 0x1fe   : > { %1680 = vmatpush.msra.mxu2 %v1602_v27  ;;  %v3447_v27 = vadd.s32 4294967224, %v3794_v43 }
 0x1ff   : > { %v3257_v35 = vpop.xlane.xlu0 %1201  ;;  %v1230_v7 = vpop.xlane.xlu1 %1229  ;;  %1698 = vmatpush.msra.mxu3 %v1620_v26  ;;  %1657 = vmatpush.msra.mxu1 %v1589_v6 }
 0x200   : > { %v3259_v12 = vpop.xlane.xlu2 %1301  ;;  %v1449_v11 = vperm.slane %v1230_v7, %v3192_v21  ;;  %v1575_v21 = vld [vmem:[%s3795_s2 + $0x50] sm:$0xff]  ;;  %1681 = vmatpush.msra.mxu2 %v1601_v9  ;;  %v1617_v7 = vld [vmem:[%s3795_s2 + $0x1a0] sm:$0xff]  ;;  %v3456_v9 = vadd.s32 4294967208, %v3794_v43 }
 0x201   : > { %1635 = vmatpush.msra.mxu0 %v1575_v21  ;;  %1699 = vmatpush.msra.mxu3 %v1619_v19  ;;  %v1614_v21 = vld [vmem:[%s3795_s2 + $0x188] sm:$0xff] }
 0x202   : > { %v3269_v15 = vsel %vm1402_vm7, %v1449_v11, %v1448_v18  ;;  %1682 = vmatpush.msra.mxu2 %v1600_v48  ;;  %v1588_v11 = vld [vmem:[%s3795_s2 + $0xb8] sm:$0xff]  ;;  %v1518_v48 = vperm.slane %v3217_v55, %v3447_v27  ;;  %v1522_v55 = vperm.slane %v3259_v12, %v3456_v9 }
 0x203   : > { %1636 = vmatpush.msra.mxu0 %v1574_v33  ;;  %1700 = vmatpush.msra.mxu3 %v1618_v34  ;;  %v1584_v33 = vld [vmem:[%s3795_s2 + $0x98] sm:$0xff] }
 0x204   : > { %1683 = vmatpush.msra.mxu2 %v1599_v39  ;;  %1658 = vmatpush.msra.mxu1 %v1588_v11  ;;  %v1581_v39 = vld [vmem:[%s3795_s2 + $0x80] sm:$0xff]  ;;  %v1519_v23 = vsel %vm1410_vm9, %v1518_v48, %v3209_v2 }
 0x205   : > { %1637 = vmatpush.msra.mxu0 %v1573_v46  ;;  %1701 = vmatpush.msra.mxu3 %v1617_v7  ;;  %v3453_v46 = vadd.s32 4294967216, %v3794_v43 }
 0x206   : > { %1684 = vmatpush.msra.mxu2 %v1598_v22  ;;  %1659 = vmatpush.msra.mxu1 %v1587_v36  ;;  %v1726_v22 = vld [vmem:[%s3732_s4 + $0x78] sm:$0xff] }
 0x207   : > { %v3295_v60 = vpop.xlane.xlu0 %1329  ;;  %v3297_v32 = vpop.xlane.xlu1 %1203  ;;  %1638 = vmatpush.msra.mxu0 %v1572_v45  ;;  %1702 = vmatpush.msra.mxu3 %v1616_v50  ;;  %v1520_v52 = vperm.slane %v3231_v29, %v3453_v46  ;;  %v1725_v29 = vld [vmem:[%s3732_s4 + $0x70] sm:$0xff] }
 0x208   : > { %v3299_v42 = vpop.xlane.xlu2 %1231  ;;  %1685 = vmatpush.msra.mxu2 %v1597_v1  ;;  %1660 = vmatpush.msra.mxu1 %v1586_v14  ;;  %v1413_v19 = vperm.slane %v3297_v32, %v3453_v46 }
 0x209   : > { %1639 = vmatpush.msra.mxu0 %v1571_v38  ;;  %1703 = vmatpush.msra.mxu3 %v1615_v59 }
 0x20a   : > { %1661 = vmatpush.msra.mxu1 %v1585_v41 }
 0x20b   : > { %1640 = vmatpush.msra.mxu0 %v1570_v8  ;;  %1704 = vmatpush.msra.mxu3 %v1614_v21  ;;  %v3479_v8 = vadd.s32 4294967184, %v3794_v43 }
 0x20c   : > { %1662 = vmatpush.msra.mxu1 %v1584_v33 }
 0x20d   : > { %1641 = vmatpush.msra.mxu0 %v1569_v24  ;;  %1705 = vmatpush.msra.mxu3 %v1613_v25  ;;  %v3496_v24 = vadd.s32 4294967176, %v3794_v43 }
 0x20e   : > { %1663 = vmatpush.msra.mxu1 %v1583_v37 }
 0x20f   : > { %v3343_v3 = vpop.xlane.xlu0 %1303  ;;  %v3345_v17 = vpop.xlane.xlu1 %1331  ;;  %1642 = vmatpush.msra.mxu0 %v1568_v28 }
 0x210   : > { %v3347_v53 = vpop.xlane.xlu2 %1205  ;;  %1664 = vmatpush.msra.mxu1 %v1582_v51  ;;  %v1524_v31 = vperm.slane %v3343_v3, %v3459_v47  ;;  %v1521_v3 = vsel %vm1414_vm10, %v1520_v52, %v1519_v23  ;;  %v1551_v59 = vperm.slane %v3345_v17, %v3453_v46  ;;  %v1451_v17 = vperm.slane %v3299_v42, %v3201_v44 }
 0x211   : > { %1643 = vmatpush.msra.mxu0 %v1567_v61  ;;  %v1523_v1 = vsel %vm1418_vm11, %v1522_v55, %v1521_v3  ;;  %v1409_v61 = vperm.slane %v3257_v35, %v3447_v27  ;;  %v1724_v3 = vld [vmem:[%s3732_s4 + $0x68] sm:$0xff] }
 0x212   : > { %1665 = vmatpush.msra.mxu1 %v1581_v39  ;;  %v1525_v57 = vsel %vm1422_vm12, %v1524_v31, %v1523_v1  ;;  %v1452_v52 = vsel %vm1406_vm8, %v1451_v17, %v3269_v15  ;;  %v1720_v1 = vld [vmem:[%s3732_s4 + $0x48] sm:$0xff] }
 0x213   : > { %1644 = vmatpush.msra.mxu0 %v1566_v0  ;;  %v1417_v0 = vperm.slane %v3347_v53, %v3456_v9  ;;  %v1411_v34 = vsel %vm1410_vm9, %v1409_v61, %v3223_v58  ;;  %v1549_v53 = vperm.slane %v3295_v60, %v3447_v27  ;;  %v1713_v61 = vld [vmem:[%s3732_s4 + $0x10] sm:$0xff] }
 0x214   : > { %v1415_v35 = vsel %vm1414_vm10, %v1413_v19, %v1411_v34  ;;  %v1711_v19 = vld [vmem:[%s3732_s4] sm:$0xff] }
 0x215   : > { %1645 = vmatpush.msra.mxu0 %v1565_v10  ;;  %v1419_v32 = vsel %vm1418_vm11, %v1417_v0, %v1415_v35  ;;  %v1550_v41 = vsel %vm1410_vm9, %v1549_v53, %v3243_v13  ;;  %v1755_v0 = vld [vmem:[%s3734_s6 + $0x30] sm:$0xff]  ;;  %v1753_v34 = vld [vmem:[%s3734_s6 + $0x20] sm:$0xff] }
 0x216   : > { %v1552_v33 = vsel %vm1414_vm10, %v1551_v59, %v1550_v41  ;;  %v1629_v35 = vld [vmem:[%s3731_s3] sm:$0x1] }
 0x217   : > { %v3391_v63 = vpop.xlane.xlu0 %1233  ;;  %v3393_v30 = vpop.xlane.xlu1 %1305  ;;  %1728 = vmatpush.msrb.mxu0 %v1726_v22  ;;  %v1727_v41 = vld [vmem:[%s3733_s5] sm:$0x1] }
 0x218   : > { %v3395_v18 = vpop.xlane.xlu2 %1333  ;;  %v1526_v12 = vperm.slane %v3393_v30, %v3466_v49  ;;  %v1453_v37 = vperm.slane %v3391_v63, %v3447_v27 }
 0x219   : > { %1729 = vmatpush.msrb.mxu0 %v1725_v29 }
 0x21a   : > { %v1527_v43 = vsel %vm1426_vm13, %v1526_v12, %v1525_v57  ;;  %v1719_v57 = vld [vmem:[%s3732_s4 + $0x40] sm:$0xff] }
 0x21b   : > { %1730 = vmatpush.msrb.mxu0 %v1724_v3 }
 0x21f   : > { %v3427_v16 = vpop.xlane.xlu0 %1207  ;;  %v3429_v40 = vpop.xlane.xlu1 %1235 }
 0x220   : > { %v1308_v20 = vpop.xlane.xlu2 %1307  ;;  %v1421_v4 = vperm.slane %v3427_v16, %v3459_v47 }
 0x221   : > { %v1528_v56 = vperm.slane %v1308_v20, %v3479_v8  ;;  %v1553_v20 = vperm.slane %v3395_v18, %v3456_v9 }
 0x222   : > { %v1423_v50 = vsel %vm1422_vm12, %v1421_v4, %v1419_v32  ;;  %v1754_v4 = vld [vmem:[%s3734_s6 + $0x28] sm:$0xff] }
 0x223   : > { %v1529_v62 = vsel %vm1430_vm14, %v1528_v56, %v1527_v43  ;;  %v1723_v56 = vld [vmem:[%s3732_s4 + $0x60] sm:$0xff]  ;;  %v1714_v43 = vld [vmem:[%s3732_s4 + $0x18] sm:$0xff] }
 0x224   : > { %1731 = vmatpush.msrb.mxu0 %v1723_v56 }
 0x227   : > { %v3461_v45 = vpop.xlane.xlu0 %1335  ;;  %v1210_v5 = vpop.xlane.xlu1 %1209 }
 0x228   : > { %v3468_v38 = vpop.xlane.xlu2 %1237  ;;  %v1425_v10 = vperm.slane %v1210_v5, %v3466_v49  ;;  %v1555_v21 = vperm.slane %v3461_v45, %v3459_v47  ;;  %v1554_v45 = vsel %vm1418_vm11, %v1553_v20, %v1552_v33  ;;  %v1455_v5 = vperm.slane %v3429_v40, %v3453_v46  ;;  %v1750_v20 = vld [vmem:[%s3734_s6 + $0x8] sm:$0xff] }
 0x229   : > { %v1457_v39 = vperm.slane %v3468_v38, %v3456_v9  ;;  %v1454_v40 = vsel %vm1410_vm9, %v1453_v37, %v1452_v52  ;;  %v1783_v37 = vld [vmem:[%s3736_s8] sm:$0xff]  ;;  %vm1950_vm9 = vcmask 7168  }
 0x22a   : > { %v1427_v16 = vsel %vm1426_vm13, %v1425_v10, %v1423_v50  ;;  %v1556_v13 = vsel %vm1422_vm12, %v1555_v21, %v1554_v45  ;;  %v1456_v9 = vsel %vm1414_vm10, %v1455_v5, %v1454_v40  ;;  %v1752_v10 = vld [vmem:[%s3734_s6 + $0x18] sm:$0xff]  ;;  %v1757_v45 = vld [vmem:[%s3796_s15] sm:$0x1]  ;;  %s2347_s15 = smov 4   ;;  %vm1952_vm10 = vcmask 15360  }
 0x22b   : > { %v1458_v38 = vsel %vm1418_vm11, %v1457_v39, %v1456_v9  ;;  %v1786_v21 = vld [vmem:[%s3736_s8 + $0x18] sm:$0xff]  ;;  %vm1954_vm11 = vcmask 23552  }
 0x22c   : > { %1804 = vmatpush.msrb.mxu2 %v1786_v21 }
 0x22f   : > { %v1310_v2 = vpop.xlane.xlu0 %1309  ;;  %v1338_v28 = vpop.xlane.xlu1 %1337 }
 0x230   : > { %v1530_v54 = vperm.slane %v1310_v2, %v3496_v24  ;;  %v1212_v26 = vpop.xlane.xlu2 %1211  ;;  %v1557_v25 = vperm.slane %v1338_v28, %v3466_v49  ;;  %v1718_v2 = vld [vmem:[%s3732_s4 + $0x38] sm:$0xff]  ;;  %v1717_v28 = vld [vmem:[%s3732_s4 + $0x30] sm:$0xff] }
 0x231   : > { %v1429_v6 = vperm.slane %v1212_v26, %v3479_v8  ;;  %v1715_v26 = vld [vmem:[%s3732_s4 + $0x20] sm:$0xff] }
 0x232   : > { %v1531_v30 = vsel %vm1434_vm15, %v1530_v54, %v1529_v62  ;;  %v1558_v42 = vsel %vm1426_vm13, %v1557_v25, %v1556_v13  ;;  %v1716_v54 = vld [vmem:[%s3732_s4 + $0x28] sm:$0xff] }
 0x233   : > { %1686 = vmatmul.f32.vlgmr.msra.gmra.mxu2 %v1531_v30  ;;  %v1431_v14 = vsel %vm1430_vm14, %v1429_v6, %v1427_v16  ;;  %v1712_v62 = vld [vmem:[%s3732_s4 + $0x8] sm:$0xff]  ;;  %v1756_v30 = vld [vmem:[%s3734_s6 + $0x38] sm:$0xff]  ;;  %v1751_v16 = vld [vmem:[%s3734_s6 + $0x10] sm:$0xff] }
 0x234   : > { %1770 = vmatpush.msrb.mxu1 %v1756_v30 }
 0x236   : > { %1771 = vmatpush.msrb.mxu1 %v1755_v0 }
 0x237   : > { %v1240_v7 = vpop.xlane.xlu0 %1239  ;;  %v1340_v11 = vpop.xlane.xlu1 %1339 }
 0x238   : > { %v1214_v36 = vpop.xlane.xlu2 %1213  ;;  %v1559_v18 = vperm.slane %v1340_v11, %v3479_v8  ;;  %v1459_v63 = vperm.slane %v1240_v7, %v3459_v47  ;;  %1772 = vmatpush.msrb.mxu1 %v1754_v4 }
 0x239   : > { %v1433_v58 = vperm.slane %v1214_v36, %v3496_v24 }
 0x23a   : > { %v1560_v27 = vsel %vm1430_vm14, %v1559_v18, %v1558_v42  ;;  %v1460_v22 = vsel %vm1422_vm12, %v1459_v63, %v1458_v38  ;;  %1773 = vmatpush.msrb.mxu1 %v1753_v34  ;;  %v1784_v18 = vld [vmem:[%s3736_s8 + $0x8] sm:$0xff]  ;;  %vm1956_vm12 = vcmask 31744  }
 0x23b   : > { %v1435_v60 = vsel %vm1434_vm15, %v1433_v58, %v1431_v14  ;;  %v1749_v14 = vld [vmem:[%s3734_s6] sm:$0xff] }
 0x23c   : > { %1646 = vmatmul.f32.vlgmr.msra.gmra.mxu0 %v1435_v60  ;;  %1774 = vmatpush.msrb.mxu1 %v1752_v10  ;;  %v1785_v60 = vld [vmem:[%s3736_s8 + $0x10] sm:$0xff] }
 0x23d   : > { %1805 = vmatpush.msrb.mxu2 %v1785_v60 }
 0x23e   : > { %1775 = vmatpush.msrb.mxu1 %v1751_v16 }
 0x23f   : > { %v1242_v48 = vpop.xlane.xlu0 %1241  ;;  %v1342_v51 = vpop.xlane.xlu1 %1341  ;;  %1806 = vmatpush.msrb.mxu2 %v1784_v18 }
 0x240   : > { %v1561_v44 = vperm.slane %v1342_v51, %v3496_v24  ;;  %v1461_v46 = vperm.slane %v1242_v48, %v3466_v49  ;;  %v1244_v55 = vpop.xlane.xlu2 %1243  ;;  %1776 = vmatpush.msrb.mxu1 %v1750_v20  ;;  %v1787_v51 = vld [vmem:[%s3797_s17] sm:$0x1]  ;;  %s2350_s17 = smov 124  }
 0x241   : > { %v1463_v15 = vperm.slane %v1244_v55, %v3479_v8  ;;  %v1722_v8 = vld [vmem:[%s3732_s4 + $0x58] sm:$0xff]  ;;  %1807 = vmatpush.msrb.mxu2 %v1783_v37 }
 0x242   : > { %v1562_v31 = vsel %vm1434_vm15, %v1561_v44, %v1560_v27  ;;  %v1462_v47 = vsel %vm1426_vm13, %v1461_v46, %v1460_v22  ;;  %1732 = vmatpush.msrb.mxu0 %v1722_v8  ;;  %1777 = vmatpush.msrb.mxu1 %v1749_v14  ;;  %vm1958_vm13 = vcmask 39936  }
 0x243   : > { %1706 = vmatmul.f32.vlgmr.msra.gmra.mxu3 %v1562_v31  ;;  %v1464_v12 = vsel %vm1430_vm14, %v1463_v15, %v1462_v47  ;;  %vm1960_vm14 = vcmask 48128  }
 0x247   : > { %v1246_v29 = vpop.xlane.xlu0 %1245 }
 0x248   : > { %v1465_v23 = vperm.slane %v1246_v29, %v3496_v24  ;;  %v1721_v24 = vld [vmem:[%s3732_s4 + $0x50] sm:$0xff] }
 0x249   : > { %1733 = vmatpush.msrb.mxu0 %v1721_v24 }
 0x24a   : > { %v1466_v49 = vsel %vm1434_vm15, %v1465_v23, %v1464_v12  ;;  %vm1962_vm15 = vcmask 56320  }
 0x24b   : > { %1666 = vmatmul.f32.vlgmr.msra.gmra.mxu1 %v1466_v49  ;;  %1734 = vmatpush.msrb.mxu0 %v1720_v1 }
 0x24d   : > { %1735 = vmatpush.msrb.mxu0 %v1719_v57 }
 0x24f   : > { %1736 = vmatpush.msrb.mxu0 %v1718_v2 }
 0x251   : > { %1737 = vmatpush.msrb.mxu0 %v1717_v28 }
 0x253   : > { %1738 = vmatpush.msrb.mxu0 %v1716_v54 }
 0x255   : > { %1739 = vmatpush.msrb.mxu0 %v1715_v26 }
 0x257   : > { %1740 = vmatpush.msrb.mxu0 %v1714_v43 }
 0x259   : > { %1741 = vmatpush.msrb.mxu0 %v1713_v61 }
 0x25b   : > { %1742 = vmatpush.msrb.mxu0 %v1712_v62 }
 0x25d   : > { %1743 = vmatpush.msrb.mxu0 %v1711_v19 }
 0x2b6   : > { %v1687_v53 = vpop.f32.mrf.mxu2 }
 0x2b9   : > { %v1647_v6 = vpop.f32.mrf.mxu0 }
 0x2ba   : > { %v1648_v32 = vadd.f32 %v1647_v6, %v1629_v35 }
 0x2c6   : > { %v1707_v36 = vpop.f32.mrf.mxu3 }
 0x2c8   : > { %v1667_v7 = vpop.f32.mrf.mxu1 }
 0x2c9   : > { %v1668_v11 = vadd.f32 %v1667_v7, %v1648_v32 }
 0x2cb   : > { %v1688_v50 = vadd.f32 %v1687_v53, %v1668_v11 }
 0x2cd   : > { %v1708_v59 = vadd.f32 %v1707_v36, %v1688_v50 }
 0x2cf   : > { %v1710_v58 = vmax.f32 %v1708_v59, 0.0 }
 0x2d1   : > { %1744 = vmatmul.f32.vlgmr.msrb.gmra.mxu0 %v1710_v58 }
 0x34e   : > { %v1745_v25 = vpop.f32.mrf.mxu0 }
 0x34f   : > { %v1746_v17 = vadd.f32 %v1745_v25, %v1727_v41 }
 0x351   : > { %v1748_v33 = vmax.f32 %v1746_v17, 0.0 }
 0x353   : > { %2120 = vmatmul.msk.f32.vlgmr.msrb.gmra.mxu1 %vm1758_vm0, %v1748_v33  ;;  %vm1964_vm0 = vcmask 64512  }
 0x3d0   : > { %v1779_v5 = vpop.f32.mrf.mxu1 }
 0x3d1   : > { %v1780_v13 = vadd.f32 %v1779_v5, %v1757_v45 }
 0x3d3   : > { %v1782_v48 = vmax.f32 %v1780_v13, 0.0 }
 0x3d5   : > { %2121 = vmatmul.msk.f32.vlgmr.msrb.gmra.mxu2 %vm1788_vm1, %v1782_v48  ;;  %vm1966_vm1 = vcmask 65536  }
 0x458   : > { %v1809_v39 = vpop.f32.mrf.mxu2 }
 0x459   : > { %v3655_v44 = vadd.f32 %v1809_v39, %v1787_v51 }
 0x45b   : > { %v1812_v42 = vmul.f32 %v3655_v44, %v3655_v44 }
 0x45d   : > { %v1814_v52 = vsel %vm1813_vm2, %v1812_v42, 0.0  ;;  %vm1972_vm2 = vcmask 16384  }
 0x45e   : > { %1815 = vadd.xlane.f32.xlu1 %v1814_v52 }
 0x4d1   : > { %v1816_v63 = vpop.xlane.xlu1 %1815 }
 0x4d2   : > { %2224 = vrsqrt.f32 %v1816_v63  ;;  %vm1824_vm3 = vcmp.eq.f32.partialorder %v1816_v63, inf  ;;  %v1827_v22 = vand.u32 2147483648, %v1816_v63  ;;  %vm1826_vm4 = vcmp.eq.f32.partialorder %v1816_v63, 0.0 }
 0x4d8   : > { %v2225_v27 = vpop.eup %2224 }
 0x4d9   : > { %v1818_v40 = vmul.f32 %v2225_v27, %v1816_v63 }
 0x4db   : > { %v1819_v46 = vmul.f32 %v2225_v27, %v1818_v40 }
 0x4dd   : > { %v1820_v55 = vmul.f32 0.5, %v1819_v46 }
 0x4df   : > { %v1821_v31 = vsub.f32 1.5, %v1820_v55 }
 0x4e1   : > { %v1822_v9 = vmul.f32 %v2225_v27, %v1821_v31 }
 0x4e3   : > { %v1823_v38 = vmul.f32 %v1822_v9, %v1816_v63 }
 0x4e5   : > { %v1825_v15 = vsel %vm1824_vm3, %v1816_v63, %v1823_v38 }
 0x4e6   : > { %v1828_v47 = vsel %vm1826_vm4, %v1827_v22, %v1825_v15 }
 0x4e7   : > { %2226 = vrcp.f32 %v1828_v47  ;;  %v1840_v49 = vand.u32 2147483648, %v1828_v47  ;;  %v1838_v56 = vand.u32 2147483647, %v1828_v47  ;;  %vm1834_vm6 = vweird.f32 %v1828_v47 }
 0x4e9   : > { %v1841_v24 = vor.u32 1.1754944e-38, %v1840_v49  ;;  %vm1839_vm8 = vcmp.eq.f32.partialorder %v1838_v56, 8.507059e+37 }
 0x4ed   : > { %v2227_v29 = vpop.eup %2226 }
 0x4ee   : > { %v1830_v23 = vmul.f32 %v2227_v29, %v1828_v47  ;;  %vm1835_vm5 = vweird.f32 %v2227_v29 }
 0x4ef   : > { %vm1836_vm7 = vmor %vm1834_vm6, %vm1835_vm5 }
 0x4f0   : > { %v1831_v12 = vsub.f32 1.0, %v1830_v23 }
 0x4f2   : > { %v1832_v3 = vmul.f32 %v2227_v29, %v1831_v12 }
 0x4f4   : > { %v1833_v8 = vadd.f32 %v2227_v29, %v1832_v3 }
 0x4f6   : > { %v1837_v1 = vsel %vm1836_vm7, %v2227_v29, %v1833_v8 }
 0x4f7   : > { %v1842_v57 = vsel %vm1839_vm8, %v1841_v24, %v1837_v1 }
 0x4f8   : > { %v1843_v2 = vmul.f32 %v1842_v57, %v3655_v44 }
 0x4fa   : > { %1846 = vrot.lane.b32.xlu1 %v1843_v2, %s2341_s30  ;;  %1862 = vrot.lane.b32.xlu0 %v1843_v2, %s2342_s28  ;;  %v1844_v28 = vmul.f32 %v1843_v2, %v1843_v2 }
 0x4fb   : > { %1854 = vrot.lane.b32.xlu2 %v1843_v2, %s2343_s12 }
 0x502   : > { %1858 = vrot.lane.b32.xlu0 %v1843_v2, %s2344_s29  ;;  %1871 = vrot.lane.b32.xlu1 %v1844_v28, %s2345_s22 }
 0x503   : > { %1850 = vrot.lane.b32.xlu2 %v1843_v2, %s2345_s22 }
 0x50a   : > { %1875 = vrot.lane.b32.xlu0 %v1844_v28, %s2343_s12 }
 0x50b   : > { %1867 = vrot.lane.b32.xlu2 %v1844_v28, %s2341_s30 }
 0x555   : > { %v1855_v54 = vpop.permute.xlu2 %1854 }
 0x556   : > { %v1857_v26 = vmul.f32 %v1855_v54, %v1843_v2 }
 0x558   : > { %v1880_v43 = vmul.f32 2.0, %v1857_v26 }
 0x55a   : > { %1882 = vrot.lane.b32.xlu2 %v1880_v43, %s2346_s14 }
 0x55d   : > { %v1851_v61 = vpop.permute.xlu2 %1850 }
 0x55e   : > { %v1853_v62 = vmul.f32 %v1851_v61, %v1843_v2 }
 0x560   : > { %v1886_v19 = vmul.f32 2.0, %v1853_v62 }
 0x562   : > { %1908 = vrot.lane.b32.xlu2 %v1886_v19, %s2346_s14 }
 0x565   : > { %v1868_v7 = vpop.permute.xlu2 %1867 }
 0x566   : > { %v1870_v50 = vadd.f32 %v1868_v7, %v1844_v28  ;;  %v1898_v16 = vsub.f32 %v1844_v28, %v1868_v7 }
 0x56c   : > { %v1847_v30 = vpop.permute.xlu1 %1846  ;;  %v1863_v0 = vpop.permute.xlu0 %1862 }
 0x56d   : > { %v1849_v4 = vmul.f32 %v1847_v30, %v1843_v2  ;;  %v1865_v34 = vmul.f32 %v1863_v0, %v1843_v2 }
 0x56f   : > { %v1901_v10 = vmul.f32 2.0, %v1849_v4  ;;  %v1887_v35 = vmul.f32 2.0, %v1865_v34 }
 0x571   : > { %1903 = vrot.lane.b32.xlu0 %v1901_v10, %s2342_s28  ;;  %1889 = vrot.lane.b32.xlu1 %v1887_v35, %s2341_s30 }
 0x574   : > { %v1859_v6 = vpop.permute.xlu0 %1858  ;;  %v1872_v53 = vpop.permute.xlu1 %1871 }
 0x575   : > { %v1861_v32 = vmul.f32 %v1859_v6, %v1843_v2  ;;  %v1874_v36 = vsub.f32 %v1870_v50, %v1872_v53  ;;  %v1899_v20 = vadd.f32 %v1898_v16, %v1872_v53  ;;  %v1916_v18 = vsub.f32 %v1898_v16, %v1872_v53 }
 0x577   : > { %v1879_v11 = vmul.f32 2.0, %v1861_v32 }
 0x579   : > { %1894 = vrot.lane.b32.xlu0 %v1879_v11, %s2341_s30  ;;  %1912 = vrot.lane.b32.xlu1 %v1879_v11, %s2345_s22 }
 0x57c   : > { %v1876_v59 = vpop.permute.xlu0 %1875 }
 0x57d   : > { %v1878_v58 = vsub.f32 %v1874_v36, %v1876_v59  ;;  %v1900_v14 = vsub.f32 %v1899_v20, %v1876_v59  ;;  %v1917_v5 = vadd.f32 %v1916_v18, %v1876_v59 }
 0x57f   : > { %1919 = vrot.lane.b32.xlu2 %v1878_v58, %s2346_s14 }
 0x587   : > { %1931 = vrot.lane.b32.xlu2 %v1900_v14, %s2343_s12 }
 0x5b4   : > { %v1883_v21 = vpop.permute.xlu2 %1882 }
 0x5b5   : > { %v1885_v60 = vsub.f32 %v1879_v11, %v1883_v21 }
 0x5b7   : > { %1923 = vrot.lane.b32.xlu1 %v1885_v60, %s2343_s12 }
 0x5bc   : > { %v1909_v37 = vpop.permute.xlu2 %1908 }
 0x5bd   : > { %v1911_v48 = vsub.f32 %v1887_v35, %v1909_v37 }
 0x5d9   : > { %v1920_v51 = vpop.permute.xlu2 %1919 }
 0x5e1   : > { %v1932_v55 = vpop.permute.xlu2 %1931 }
 0x5e3   : > { %v1904_v41 = vpop.permute.xlu0 %1903  ;;  %v1890_v25 = vpop.permute.xlu1 %1889 }
 0x5e4   : > { %v1906_v17 = vsub.f32 %v1879_v11, %v1904_v41  ;;  %v1892_v33 = vadd.f32 %v1890_v25, %v1886_v19 }
 0x5e6   : > { %1927 = vrot.lane.b32.xlu0 %v1892_v33, %s2344_s29  ;;  %1935 = vrot.lane.b32.xlu1 %v1906_v17, %s2347_s15 }
 0x5eb   : > { %v1913_v45 = vpop.permute.xlu1 %1912  ;;  %v1895_v39 = vpop.permute.xlu0 %1894 }
 0x5ec   : > { %v1915_v13 = vadd.f32 %v1913_v45, %v1901_v10  ;;  %v1897_v27 = vadd.f32 %v1895_v39, %v1880_v43 }
 0x5ee   : > { %1943 = vrot.lane.b32.xlu2 %v1915_v13, %s2347_s15  ;;  %1947 = vrot.lane.b32.xlu1 %v1917_v5, %s2348_s0 }
 0x5ef   : > { %1939 = vrot.lane.b32.xlu0 %v1911_v48, %s2349_s9 }
 0x5f7   : > { %1969 = vrot.lane.b32.xlu0 %v3655_v44, %s2350_s17 }
 0x629   : > { %v1924_v42 = vpop.permute.xlu1 %1923 }
 0x62a   : > { %v1951_v52 = vsel %vm1950_vm9, %v1920_v51, %v1924_v42 }
 0x648   : > { %v1944_v22 = vpop.permute.xlu2 %1943 }
 0x658   : > { %v1928_v63 = vpop.permute.xlu0 %1927  ;;  %v1936_v46 = vpop.permute.xlu1 %1935 }
 0x659   : > { %v1953_v40 = vsel %vm1952_vm10, %v1951_v52, %v1928_v63 }
 0x65a   : > { %v1955_v31 = vsel %vm1954_vm11, %v1953_v40, %v1897_v27 }
 0x65b   : > { %v1957_v9 = vsel %vm1956_vm12, %v1955_v31, %v1932_v55 }
 0x65c   : > { %v1959_v44 = vsel %vm1958_vm13, %v1957_v9, %v1936_v46 }
 0x660   : > { %v1948_v47 = vpop.permute.xlu1 %1947 }
 0x661   : > { %v1940_v38 = vpop.permute.xlu0 %1939 }
 0x662   : > { %v1961_v15 = vsel %vm1960_vm14, %v1959_v44, %v1940_v38 }
 0x663   : > { %v1963_v29 = vsel %vm1962_vm15, %v1961_v15, %v1944_v22 }
 0x664   : > { %v1965_v23 = vsel %vm1964_vm0, %v1963_v29, %v1948_v47 }
 0x665   : > { %1967 = vst.msk [vmem:[%s750_s11] sm:$0x1] %vm1966_vm1, %v1965_v23 }
 0x669   : > { %v1970_v12 = vpop.permute.xlu0 %1969 }
 0x66a   : > { %1973 = vst.msk [vmem:[%s3003_s13] sm:$0x1] %vm1972_vm2, %v1970_v12 }
 0x66b PF: > { %s3798_s22 = sld [smem:[#allocation34_spill]]  ;;  %s1991_s0 = sshll.u32 %s3003_s13, 4  ;;  %s1992_s0 = int_to_ptr.vmem [resolvable:$true] %s1991_s0 }
 0x66c   : > { %s3800_s17 = sand.u32 1, %s2306_s18  }
 0x66d   : > { %s1978_s30 = scalar_lea.sflag [#allocation7], %s3800_s17 }
 0x671   : > { %s3799_s14 = smov %s3798_s22  ;;  %s1989_s15 = scalar_lea.hbm %s3798_s22, %s2326_s23 }
 0x672   : > { %s1993_s9 = sshll.u32 %s1989_s15, 4  ;;  %s2248_s12 = scalar_lea.hbm %s3799_s14, 2  ;;  %s1994_s9 = int_to_ptr.hbm [resolvable:$true] %s1993_s9 }
 0x673   : > { %s2242_s20 = sshra.s32 %s1994_s9, 4  ;;  %s2243_s20 = int_to_ptr.hbm [resolvable:$true] %s2242_s20 }
 0x674   : > { %s2244_s11 = scalar_lea.hbm %s2243_s20, 1  ;;  %p2249_p10 = scmp.lt.s32.totalorder %s2243_s20, %s3799_s14 }
 0x675   : > { %p2245_p6 = scmp.ne.s32.totalorder %s2243_s20, %s2244_s11  ;;  %p2250_p11 = scmp.lt.s32.totalorder %s2248_s12, %s2244_s11 }
 0x677   : > { %p2246_p8 = pnand %p2245_p6, %p2483_p7  ;;  %p2251_p13 = por %p2250_p11, %p2249_p10 }
 0x679   : > { %p2247_p9 = pneg %p2246_p8 }
 0x67b   : > { %p2252_p0 = pnand %p2251_p13, %p2247_p9 }
 0x67d   : > { %2255 = shalt.err (!%p2252_p0)
}
 0x67e   : > { %2126 = dma.vmem_to_hbm [thread:$0]  (%p2483_p7), %s1992_s0, 16, %s1994_s9, %s1978_s30  }
 0x67f PF: > { %s3801_s23 = sld [smem:[#allocation9_spill]]  ;;  %p2132_p1 = scmp.ge.s32.totalorder %s2338_s26, 2 }
 0x681   : > { %p2129_p2 = pnand %p2132_p1, %p2491_p12 }
 0x683   : > { %p2130_p3 = pneg %p2129_p2 }
 0x685   : > { %s2011_s22 = sand.u32 1, %s3801_s23  }
 0x686   : > { %s2012_s1 = scalar_lea.sflag [#allocation7], %s2011_s22 }
 0x687   : > { %2297 = dma.done.wait (%p2130_p3), %s2012_s1, 16  }
 0x688   : > { %2299 = vsyncadd (%p2130_p3), %s2012_s1, 4294967280  ;;  %s25_s26 = sadd.s32 1, %s2338_s26   ;;  %s3803_s2 = sld [smem:[#allocation10_spill]] }
 0x689   : > { %p22_p4 = scmp.ge.s32.totalorder %s25_s26, 8   ;;  %s3804_s16 = sld [smem:[#allocation11_spill]] }
 0x68a   : > { %s3805_s17 = smov %s2306_s18  ;;  %s3806_s18 = smov %s2310_s19 }
 0x68b   : > { %s3807_s19 = smov %s2496_s7  ;;  %s3808_s20 = smov %s2318_s21 }
 0x68c   : > { %s3809_s21 = smov %s2499_s27  ;;  %s3810_s22 = smov %s2330_s24 }
 0x68d   : > { %s3811_s23 = smov %s2334_s25  ;;  %24 = sbr.rel (!%p22_p4) target bundleno = 13 (0xd), region = 204 }
 0x68e   : > { %s3812_s24 = smov %s3803_s2 }
 0x68f   : > { %s3813_s25 = smov %s3804_s16 }
 0x692   :  { %2017 = vsyncpa [#allocation7], 1 }
 0x693   :  { %2019 = vsyncpa [#allocation7 + $0x1], 1 }

</bundles_post_ra>
